<compile_context>
chip_gen: v7x
topology: tpu7x:2x2x1
jax: 0.10.0
libtpu: 0.0.40
codegen_flags: <defaults>
</compile_context>

<pallas_src>
import functools

import jax
import jax.numpy as jnp
import numpy as np
from jax.experimental import pallas as pl
from jax.experimental.pallas import tpu as pltpu


# ----------------------------- host-side helpers -----------------------------
def _out_hw(H, W, stride):
    return (H - 1) // stride + 1, (W - 1) // stride + 1


def _dw_tap_masks(H, W, dilation, nb):
    """(9, nb*H*W) f32 validity mask per 3x3 tap (padding == dilation)."""
    HW = H * W
    q = np.arange(HW)
    y, x = q // W, q % W
    m = np.zeros((9, HW), np.float32)
    for t in range(9):
        dy, dx = (t // 3 - 1) * dilation, (t % 3 - 1) * dilation
        m[t] = ((y + dy >= 0) & (y + dy < H) & (x + dx >= 0) & (x + dx < W))
    return jnp.asarray(np.tile(m, (1, nb)))


def _dw_tap_matrices(H, W, stride, dilation, nb):
    """(9, nb*HW, nb*HW_out) 0/1 matrices folding tap shift + boundary + stride.

    Block-diagonal across the nb lane-fused images; run on the MXU in-kernel.
    """
    HW = H * W
    H_out, W_out = _out_hw(H, W, stride)
    HW_out = H_out * W_out
    L, L_out = nb * HW, nb * HW_out
    S = np.zeros((9, L, L_out), np.float32)
    qo = np.arange(HW_out)
    yo, xo = qo // W_out, qo % W_out
    for t in range(9):
        dy, dx = (t // 3 - 1) * dilation, (t % 3 - 1) * dilation
        ys, xs = yo * stride + dy, xo * stride + dx
        valid = (ys >= 0) & (ys < H) & (xs >= 0) & (xs < W)
        cols = np.nonzero(valid)[0]
        src = ys[cols] * W + xs[cols]
        for n in range(nb):
            S[t, n * HW + src, n * HW_out + cols] = 1.0
    return jnp.asarray(S)


def _se_segment_matrices(nb, HW_out):
    """pool: (nb*HW_out, nb) with 1/HW_out entries; bcast: (nb, nb*HW_out) 0/1."""
    bcast = np.kron(np.eye(nb, dtype=np.float32), np.ones((1, HW_out), np.float32))
    pool = (bcast.T / np.float32(HW_out)).astype(np.float32)
    return jnp.asarray(pool), jnp.asarray(bcast)


def _is_single_tensorcore_chip():
    try:
        kind = jax.devices()[0].device_kind.lower()
    except Exception:
        return False
    return any(s in kind for s in ("v5 lite", "v5e", "v5litepod", "v6 lite", "v6e"))


def _vmem_estimate_bytes(nb, Cin, Chid, Cout, HW, HW_out, stride):
    L, L_out = nb * HW, nb * HW_out
    io = 2 * 4 * (Cin * L + Cout * L_out)                         # double-buffered in/out
    tmp = 4 * 4 * Chid * max(L, L_out) + 4 * Cout * L_out         # h / tap / acc / g + o
    aux = 4 * (9 * L if stride == 1 else 9 * L * L_out)
    return io + tmp + aux


def _pick_images_per_step(N, Cin, Chid, Cout, HW, HW_out, stride, budget=24 << 20):
    fits = [d for d in range(1, N + 1)
            if N % d == 0
            and _vmem_estimate_bytes(d, Cin, Chid, Cout, HW, HW_out, stride) <= budget]
    if not fits:
        return 1
    if _is_single_tensorcore_chip():
        return max(fits)                    # grid is a serial loop on 1-TC chips
    multi = [d for d in fits if N // d >= 2]
    return max(multi) if multi else max(fits)   # keep >=2 blocks for v7x megacore


# ---------------------------------- kernel ------------------------------------
def _bottleneck_kernel(x_ref, w1_ref, b1_ref, w2_ref, b2_ref, w3_ref, b3_ref,
                       wse1_ref, wse2_ref, pool_ref, bcast_ref, aux_ref, o_ref,
                       *, H, W, stride, dilation, use_residual, nb):
    HW = H * W
    d = dilation
    L = nb * HW
    Chid = w2_ref.shape[0]
    H_out, W_out = (H - 1) // stride + 1, (W - 1) // stride + 1
    L_out = nb * H_out * W_out

    x = x_ref[...].astype(jnp.float32)                               # (Cin, L)
    w2 = w2_ref[...]                                                 # (Chid, 9)

    # ---- conv1 (1x1) + folded BN1 + ReLU6: one MXU matmul for all nb images ----
    h = jnp.dot(w1_ref[...], x, preferred_element_type=jnp.float32)  # (Chid, L)
    h = jnp.clip(h + b1_ref[...], 0.0, 6.0)

    # ---- depthwise 3x3 ----------------------------------------------------------
    if stride == 1:
        # roll-based taps (XLU slot) + precomputed validity masks (VPU selects)
        masks = aux_ref[...]                                         # (9, L)
        acc = h * w2[:, 4:5]                                         # center tap: always valid
        for t in range(9):
            if t == 4:
                continue
            dy, dx = (t // 3 - 1) * d, (t % 3 - 1) * d
            off = dy * W + dx
            tap = pltpu.roll(h, (-off) % L, 1)                       # tap[p] = h[p + off]
            acc = acc + (tap * masks[t:t + 1, :]) * w2[:, t:t + 1]
    else:
        # MXU tap-selection matrices: shift + boundary + stride folded on the host;
        # produces (Chid, L_out) directly (no stride^2 waste, no post-decimation).
        acc = jnp.zeros((Chid, L_out), jnp.float32)
        for t in range(9):
            acc = acc + jnp.dot(h, aux_ref[t],
                                preferred_element_type=jnp.float32) * w2[:, t:t + 1]
    g = jnp.clip(acc + b2_ref[...], 0.0, 6.0)                        # (Chid, L_out)

    # ---- conv3 (1x1) + folded BN3 -----------------------------------------------
    o = jnp.dot(w3_ref[...], g, preferred_element_type=jnp.float32) + b3_ref[...]

    # ---- SE: per-image avg pool / rescale via tiny segment-matrix matmuls --------
    p = jnp.dot(o, pool_ref[...], preferred_element_type=jnp.float32)        # (Cout, nb)
    y = jnp.maximum(jnp.dot(wse1_ref[...], p, preferred_element_type=jnp.float32), 0.0)
    y = jax.nn.sigmoid(jnp.dot(wse2_ref[...], y, preferred_element_type=jnp.float32))
    o = o * jnp.dot(y, bcast_ref[...], preferred_element_type=jnp.float32)   # (Cout, L_out)

    if use_residual:
        o = o + x

    o_ref[...] = o.astype(o_ref.dtype)


# --------------------------------- wrapper ------------------------------------
def improved_bottleneck_pallas(x_nchw, params, *, stride, dilation, use_residual,
                               images_per_step=None):
    (w1, s1, b1, w2, s2, b2, w3, s3, b3, wse1, wse2) = params
    N, Cin, H, W = x_nchw.shape
    Chid = w1.shape[1]
    Cout = w3.shape[1]
    assert stride >= 1
    assert 0 < dilation < min(H, W), "row-wrap masking assumes dilation < spatial size"
    HW = H * W
    H_out, W_out = _out_hw(H, W, stride)
    HW_out = H_out * W_out

    f32 = jnp.float32
    # fold inference BN scales into conv weights; (out_ch, in_ch) layouts for the kernel
    w1k = (w1 * s1).T.astype(f32)                                 # (Chid, Cin)
    b1k = b1.T.astype(f32)                                        # (Chid, 1)
    w2k = (w2 * s2[0]).reshape(9, Chid).T.astype(f32)             # (Chid, 9); t = ky*3 + kx
    b2k = b2.T.astype(f32)                                        # (Chid, 1)
    w3k = (w3 * s3).T.astype(f32)                                 # (Cout, Chid)
    b3k = b3.T.astype(f32)                                        # (Cout, 1)
    wse1k = wse1.T.astype(f32)                                    # (Cr, Cout)
    wse2k = wse2.T.astype(f32)                                    # (Cout, Cr)
    Cr = wse1k.shape[0]

    nb = images_per_step or _pick_images_per_step(N, Cin, Chid, Cout, HW, HW_out, stride)
    assert N % nb == 0, "batch must be divisible by images_per_step"
    G = N // nb
    L, L_out = nb * HW, nb * HW_out

    # fuse the batch onto the 128-lane axis: (N, Cin, H, W) -> (G*Cin, nb*HW)
    x_k = x_nchw.reshape(G, nb, Cin, HW).transpose(0, 2, 1, 3).reshape(G * Cin, L)

    pool_m, bcast_m = _se_segment_matrices(nb, HW_out)
    if stride == 1:
        aux = _dw_tap_masks(H, W, dilation, nb)                   # (9, L)
        aux_spec = pl.BlockSpec((9, L), lambda b: (0, 0))
    else:
        # TODO(synk): tap matrices scale as 9*L*L_out*4B; for large feature maps a
        #             roll-based strided depthwise should be used instead.
        aux = _dw_tap_matrices(H, W, stride, dilation, nb)        # (9, L, L_out)
        aux_spec = pl.BlockSpec((9, L, L_out), lambda b: (0, 0, 0))

    kernel = functools.partial(
        _bottleneck_kernel, H=H, W=W, stride=stride, dilation=dilation,
        use_residual=use_residual, nb=nb)

    full2 = lambda b: (0, 0)
    flops = 2 * N * (Chid * Cin * HW + 9 * Chid * HW_out + Cout * Chid * HW_out
                     + 2 * Cr * Cout)
    bytes_accessed = 4 * (N * Cin * HW + N * Cout * HW_out
                          + w1k.size + w2k.size + w3k.size + int(aux.size))
    cost = pl.CostEstimate(flops=int(flops), transcendentals=int(N * Cout),
                           bytes_accessed=int(bytes_accessed))

    est = _vmem_estimate_bytes(nb, Cin, Chid, Cout, HW, HW_out, stride)
    vlim = int(min(2 * est, 64 << 20)) if est > (30 << 20) else None

    out_flat = pl.pallas_call(
        kernel,
        out_shape=jax.ShapeDtypeStruct((G * Cout, L_out), x_nchw.dtype),
        grid_spec=pltpu.PrefetchScalarGridSpec(
            num_scalar_prefetch=0,
            grid=(G,),
            in_specs=[
                pl.BlockSpec((Cin, L), lambda b: (b, 0)),
                pl.BlockSpec((Chid, Cin), full2),
                pl.BlockSpec((Chid, 1), full2),
                pl.BlockSpec((Chid, 9), full2),
                pl.BlockSpec((Chid, 1), full2),
                pl.BlockSpec((Cout, Chid), full2),
                pl.BlockSpec((Cout, 1), full2),
                pl.BlockSpec((Cr, Cout), full2),
                pl.BlockSpec((Cout, Cr), full2),
                pl.BlockSpec((L_out, nb), full2),
                pl.BlockSpec((nb, L_out), full2),
                aux_spec,
            ],
            out_specs=pl.BlockSpec((Cout, L_out), lambda b: (b, 0)),
        ),
        compiler_params=pltpu.CompilerParams(
            dimension_semantics=("parallel",), vmem_limit_bytes=vlim),
        cost_estimate=cost,
    )(x_k, w1k, b1k, w2k, b2k, w3k, b3k, wse1k, wse2k, pool_m, bcast_m, aux)

    # un-fuse the lane axis back to NCHW
    return (out_flat.reshape(G, Cout, nb, HW_out).transpose(0, 2, 1, 3)
            .reshape(N, Cout, H_out, W_out))


# ------------------------- pure-JAX reference (NHWC) -------------------------
def improved_bottleneck_ref(x_nchw, params, *, stride, dilation, use_residual):
    (w1, s1, b1, w2, s2, b2, w3, s3, b3, wse1, wse2) = params
    x = jnp.transpose(x_nchw, (0, 2, 3, 1))
    Chid = w1.shape[1]
    h = jnp.einsum('nhwi,io->nhwo', x, w1)
    h = jnp.clip(h * s1 + b1, 0.0, 6.0)
    g = jax.lax.conv_general_dilated(
        h, w2.reshape(3, 3, 1, Chid),
        window_strides=(stride, stride),
        padding=[(dilation, dilation), (dilation, dilation)],
        rhs_dilation=(dilation, dilation),
        dimension_numbers=('NHWC', 'HWIO', 'NHWC'),
        feature_group_count=Chid)
    g = jnp.clip(g * s2 + b2, 0.0, 6.0)
    o = jnp.einsum('nhwi,io->nhwo', g, w3) * s3 + b3
    y = o.mean(axis=(1, 2))
    y = jnp.maximum(y @ wse1, 0.0)
    y = jax.nn.sigmoid(y @ wse2)
    o = o * y[:, None, None, :]
    if use_residual:
        o = o + x
    return jnp.transpose(o, (0, 3, 1, 2))


# ------------------------------ parameter setup ------------------------------
def make_params(key, in_channels, out_channels, expansion_factor, reduction=16):
    hidden = in_channels * expansion_factor
    cr = out_channels // reduction
    eps = 1e-5
    ks = jax.random.split(key, 16)

    def bn_fold(kg, kb, km, kv, c):
        gamma = jax.random.uniform(kg, (c,), jnp.float32, 0.5, 1.5)
        beta = 0.1 * jax.random.normal(kb, (c,), jnp.float32)
        mean = 0.1 * jax.random.normal(km, (c,), jnp.float32)
        var = jax.random.uniform(kv, (c,), jnp.float32, 0.5, 1.5)
        scale = gamma / jnp.sqrt(var + eps)
        bias = beta - mean * scale
        return scale.reshape(1, c), bias.reshape(1, c)

    w1 = 0.1 * jax.random.normal(ks[0], (in_channels, hidden), jnp.float32)
    w2 = 0.1 * jax.random.normal(ks[1], (3, 3, hidden), jnp.float32)           # depthwise
    w3 = 0.1 * jax.random.normal(ks[2], (hidden, out_channels), jnp.float32)
    s1, b1 = bn_fold(ks[3], ks[4], ks[5], ks[6], hidden)
    s2, b2 = bn_fold(ks[7], ks[8], ks[9], ks[10], hidden)
    s3, b3 = bn_fold(ks[11], ks[12], ks[13], ks[14], out_channels)
    kse1, kse2 = jax.random.split(ks[15])
    wse1 = 0.1 * jax.random.normal(kse1, (out_channels, cr), jnp.float32)      # fc1.T
    wse2 = 0.1 * jax.random.normal(kse2, (cr, out_channels), jnp.float32)      # fc2.T
    return (w1, s1, b1, w2, s2, b2, w3, s3, b3, wse1, wse2)


if __name__ == "__main__":
    key = jax.random.PRNGKey(0)
    k1, k2, k3, k4 = jax.random.split(key, 4)

    # Config A: ImprovedBottleneck(16, 16, expansion=2, stride=1, dilation=1)
    #           -> residual branch active (roll-based depthwise path).
    in_c, out_c, exp, stride, dil = 16, 16, 2, 1, 1
    use_res = (in_c == out_c) and (stride == 1)
    x = jax.random.normal(k1, (2, in_c, 16, 16), jnp.float32)   # NCHW like PyTorch
    params = make_params(k2, in_c, out_c, exp)
    out = jax.block_until_ready(
        improved_bottleneck_pallas(x, params, stride=stride, dilation=dil,
                                   use_residual=use_res))
    ref = improved_bottleneck_ref(x, params, stride=stride, dilation=dil,
                                  use_residual=use_res)
    assert out.shape == ref.shape == (2, out_c, 16, 16)
    assert jnp.allclose(out, ref, atol=1e-4, rtol=1e-4), "config A mismatch vs reference"

    # Config B: ImprovedBottleneck(16, 24, expansion=2, stride=2, dilation=1)
    #           -> strided, non-residual (MXU tap-matrix depthwise path).
    in_c, out_c, exp, stride, dil = 16, 24, 2, 2, 1
    use_res = (in_c == out_c) and (stride == 1)
    x2 = jax.random.normal(k3, (2, in_c, 16, 16), jnp.float32)
    params2 = make_params(k4, in_c, out_c, exp)
    out2 = jax.block_until_ready(
        improved_bottleneck_pallas(x2, params2, stride=stride, dilation=dil,
                                   use_residual=use_res))
    ref2 = improved_bottleneck_ref(x2, params2, stride=stride, dilation=dil,
                                   use_residual=use_res)
    assert out2.shape == ref2.shape == (2, out_c, 8, 8)
    assert jnp.allclose(out2, ref2, atol=1e-4, rtol=1e-4), "config B mismatch vs reference"

    print("KERNEL_OK")
</pallas_src>

<mosaic_0001>
module attributes {stable_mosaic.version = 11 : i64} {
  func.func @_bottleneck_kernel(%arg0: i32, %arg1: memref<16x256xf32, #tpu.memory_space<vmem>>, %arg2: memref<32x16xf32, #tpu.memory_space<vmem>>, %arg3: memref<32x1xf32, #tpu.memory_space<vmem>>, %arg4: memref<32x9xf32, #tpu.memory_space<vmem>>, %arg5: memref<32x1xf32, #tpu.memory_space<vmem>>, %arg6: memref<16x32xf32, #tpu.memory_space<vmem>>, %arg7: memref<16x1xf32, #tpu.memory_space<vmem>>, %arg8: memref<1x16xf32, #tpu.memory_space<vmem>>, %arg9: memref<16x1xf32, #tpu.memory_space<vmem>>, %arg10: memref<256x1xf32, #tpu.memory_space<vmem>>, %arg11: memref<1x256xf32, #tpu.memory_space<vmem>>, %arg12: memref<9x256xf32, #tpu.memory_space<vmem>>, %arg13: memref<16x256xf32, #tpu.memory_space<vmem>>) attributes {dimension_semantics = [#tpu.dimension_semantics<parallel>], iteration_bounds = array<i64: 2>, scalar_prefetch = 0 : i64, scratch_operands = 0 : i64, tpu.core_type = #tpu.core_type<tc>, window_params = [{transform_indices = @transform_0, window_bounds = array<i64: 16, 256>}, {pipeline_mode = #tpu.pipeline_mode<synchronous>, transform_indices = @transform_1, window_bounds = array<i64: 32, 16>}, {pipeline_mode = #tpu.pipeline_mode<synchronous>, transform_indices = @transform_2, window_bounds = array<i64: 32, 1>}, {pipeline_mode = #tpu.pipeline_mode<synchronous>, transform_indices = @transform_3, window_bounds = array<i64: 32, 9>}, {pipeline_mode = #tpu.pipeline_mode<synchronous>, transform_indices = @transform_4, window_bounds = array<i64: 32, 1>}, {pipeline_mode = #tpu.pipeline_mode<synchronous>, transform_indices = @transform_5, window_bounds = array<i64: 16, 32>}, {pipeline_mode = #tpu.pipeline_mode<synchronous>, transform_indices = @transform_6, window_bounds = array<i64: 16, 1>}, {pipeline_mode = #tpu.pipeline_mode<synchronous>, transform_indices = @transform_7, window_bounds = array<i64: 1, 16>}, {pipeline_mode = #tpu.pipeline_mode<synchronous>, transform_indices = @transform_8, window_bounds = array<i64: 16, 1>}, {pipeline_mode = #tpu.pipeline_mode<synchronous>, transform_indices = @transform_9, window_bounds = array<i64: 256, 1>}, {pipeline_mode = #tpu.pipeline_mode<synchronous>, transform_indices = @transform_10, window_bounds = array<i64: 1, 256>}, {pipeline_mode = #tpu.pipeline_mode<synchronous>, transform_indices = @transform_11, window_bounds = array<i64: 9, 256>}, {transform_indices = @transform_12, window_bounds = array<i64: 16, 256>}]} {
    %c0 = arith.constant 0 : index
    %c0_0 = arith.constant 0 : index
    %0 = vector.load %arg1[%c0, %c0_0] : memref<16x256xf32, #tpu.memory_space<vmem>>, vector<16x256xf32>
    %c0_1 = arith.constant 0 : index
    %c0_2 = arith.constant 0 : index
    %1 = vector.load %arg4[%c0_1, %c0_2] : memref<32x9xf32, #tpu.memory_space<vmem>>, vector<32x9xf32>
    %c0_3 = arith.constant 0 : index
    %c0_4 = arith.constant 0 : index
    %2 = vector.load %arg2[%c0_3, %c0_4] : memref<32x16xf32, #tpu.memory_space<vmem>>, vector<32x16xf32>
    %cst = arith.constant dense<0.000000e+00> : vector<32x256xf32>
    %3 = tpu.matmul %2, %0, %cst {dimension_numbers = #tpu.dot_dimension_numbers<[1], [0], [0], [1], [0, 0, 1, 1], [], []>} : vector<32x16xf32>, vector<16x256xf32>, vector<32x256xf32> -> vector<32x256xf32>
    %c0_5 = arith.constant 0 : index
    %c0_6 = arith.constant 0 : index
    %4 = vector.load %arg3[%c0_5, %c0_6] : memref<32x1xf32, #tpu.memory_space<vmem>>, vector<32x1xf32>
    %5 = vector.broadcast %4 : vector<32x1xf32> to vector<32x256xf32>
    %6 = arith.addf %3, %5 : vector<32x256xf32>
    %cst_7 = arith.constant 0.000000e+00 : f32
    %cst_8 = arith.constant 6.000000e+00 : f32
    %7 = vector.broadcast %cst_7 : f32 to vector<32x256xf32>
    %8 = arith.maximumf %7, %6 : vector<32x256xf32>
    %9 = vector.broadcast %cst_8 : f32 to vector<32x256xf32>
    %10 = arith.minimumf %9, %8 : vector<32x256xf32>
    %c0_9 = arith.constant 0 : index
    %c0_10 = arith.constant 0 : index
    %11 = vector.load %arg12[%c0_9, %c0_10] : memref<9x256xf32, #tpu.memory_space<vmem>>, vector<9x256xf32>
    %12 = vector.extract_strided_slice %1 {offsets = [0, 4], sizes = [32, 1], strides = [1, 1]} : vector<32x9xf32> to vector<32x1xf32>
    %13 = vector.broadcast %12 : vector<32x1xf32> to vector<32x256xf32>
    %14 = arith.mulf %10, %13 : vector<32x256xf32>
    %c17_i32 = arith.constant 17 : i32
    %15 = tpu.dynamic_rotate %10 by %c17_i32 dim 1 : vector<32x256xf32>, i32 -> vector<32x256xf32>
    %16 = vector.extract_strided_slice %11 {offsets = [0, 0], sizes = [1, 256], strides = [1, 1]} : vector<9x256xf32> to vector<1x256xf32>
    %17 = vector.broadcast %16 : vector<1x256xf32> to vector<32x256xf32>
    %18 = arith.mulf %15, %17 : vector<32x256xf32>
    %19 = vector.extract_strided_slice %1 {offsets = [0, 0], sizes = [32, 1], strides = [1, 1]} : vector<32x9xf32> to vector<32x1xf32>
    %20 = vector.broadcast %19 : vector<32x1xf32> to vector<32x256xf32>
    %21 = arith.mulf %18, %20 : vector<32x256xf32>
    %22 = arith.addf %14, %21 : vector<32x256xf32>
    %c16_i32 = arith.constant 16 : i32
    %23 = tpu.dynamic_rotate %10 by %c16_i32 dim 1 : vector<32x256xf32>, i32 -> vector<32x256xf32>
    %24 = vector.extract_strided_slice %11 {offsets = [1, 0], sizes = [1, 256], strides = [1, 1]} : vector<9x256xf32> to vector<1x256xf32>
    %25 = vector.broadcast %24 : vector<1x256xf32> to vector<32x256xf32>
    %26 = arith.mulf %23, %25 : vector<32x256xf32>
    %27 = vector.extract_strided_slice %1 {offsets = [0, 1], sizes = [32, 1], strides = [1, 1]} : vector<32x9xf32> to vector<32x1xf32>
    %28 = vector.broadcast %27 : vector<32x1xf32> to vector<32x256xf32>
    %29 = arith.mulf %26, %28 : vector<32x256xf32>
    %30 = arith.addf %22, %29 : vector<32x256xf32>
    %c15_i32 = arith.constant 15 : i32
    %31 = tpu.dynamic_rotate %10 by %c15_i32 dim 1 : vector<32x256xf32>, i32 -> vector<32x256xf32>
    %32 = vector.extract_strided_slice %11 {offsets = [2, 0], sizes = [1, 256], strides = [1, 1]} : vector<9x256xf32> to vector<1x256xf32>
    %33 = vector.broadcast %32 : vector<1x256xf32> to vector<32x256xf32>
    %34 = arith.mulf %31, %33 : vector<32x256xf32>
    %35 = vector.extract_strided_slice %1 {offsets = [0, 2], sizes = [32, 1], strides = [1, 1]} : vector<32x9xf32> to vector<32x1xf32>
    %36 = vector.broadcast %35 : vector<32x1xf32> to vector<32x256xf32>
    %37 = arith.mulf %34, %36 : vector<32x256xf32>
    %38 = arith.addf %30, %37 : vector<32x256xf32>
    %c1_i32 = arith.constant 1 : i32
    %39 = tpu.dynamic_rotate %10 by %c1_i32 dim 1 : vector<32x256xf32>, i32 -> vector<32x256xf32>
    %40 = vector.extract_strided_slice %11 {offsets = [3, 0], sizes = [1, 256], strides = [1, 1]} : vector<9x256xf32> to vector<1x256xf32>
    %41 = vector.broadcast %40 : vector<1x256xf32> to vector<32x256xf32>
    %42 = arith.mulf %39, %41 : vector<32x256xf32>
    %43 = vector.extract_strided_slice %1 {offsets = [0, 3], sizes = [32, 1], strides = [1, 1]} : vector<32x9xf32> to vector<32x1xf32>
    %44 = vector.broadcast %43 : vector<32x1xf32> to vector<32x256xf32>
    %45 = arith.mulf %42, %44 : vector<32x256xf32>
    %46 = arith.addf %38, %45 : vector<32x256xf32>
    %c255_i32 = arith.constant 255 : i32
    %47 = tpu.dynamic_rotate %10 by %c255_i32 dim 1 : vector<32x256xf32>, i32 -> vector<32x256xf32>
    %48 = vector.extract_strided_slice %11 {offsets = [5, 0], sizes = [1, 256], strides = [1, 1]} : vector<9x256xf32> to vector<1x256xf32>
    %49 = vector.broadcast %48 : vector<1x256xf32> to vector<32x256xf32>
    %50 = arith.mulf %47, %49 : vector<32x256xf32>
    %51 = vector.extract_strided_slice %1 {offsets = [0, 5], sizes = [32, 1], strides = [1, 1]} : vector<32x9xf32> to vector<32x1xf32>
    %52 = vector.broadcast %51 : vector<32x1xf32> to vector<32x256xf32>
    %53 = arith.mulf %50, %52 : vector<32x256xf32>
    %54 = arith.addf %46, %53 : vector<32x256xf32>
    %c241_i32 = arith.constant 241 : i32
    %55 = tpu.dynamic_rotate %10 by %c241_i32 dim 1 : vector<32x256xf32>, i32 -> vector<32x256xf32>
    %56 = vector.extract_strided_slice %11 {offsets = [6, 0], sizes = [1, 256], strides = [1, 1]} : vector<9x256xf32> to vector<1x256xf32>
    %57 = vector.broadcast %56 : vector<1x256xf32> to vector<32x256xf32>
    %58 = arith.mulf %55, %57 : vector<32x256xf32>
    %59 = vector.extract_strided_slice %1 {offsets = [0, 6], sizes = [32, 1], strides = [1, 1]} : vector<32x9xf32> to vector<32x1xf32>
    %60 = vector.broadcast %59 : vector<32x1xf32> to vector<32x256xf32>
    %61 = arith.mulf %58, %60 : vector<32x256xf32>
    %62 = arith.addf %54, %61 : vector<32x256xf32>
    %c240_i32 = arith.constant 240 : i32
    %63 = tpu.dynamic_rotate %10 by %c240_i32 dim 1 : vector<32x256xf32>, i32 -> vector<32x256xf32>
    %64 = vector.extract_strided_slice %11 {offsets = [7, 0], sizes = [1, 256], strides = [1, 1]} : vector<9x256xf32> to vector<1x256xf32>
    %65 = vector.broadcast %64 : vector<1x256xf32> to vector<32x256xf32>
    %66 = arith.mulf %63, %65 : vector<32x256xf32>
    %67 = vector.extract_strided_slice %1 {offsets = [0, 7], sizes = [32, 1], strides = [1, 1]} : vector<32x9xf32> to vector<32x1xf32>
    %68 = vector.broadcast %67 : vector<32x1xf32> to vector<32x256xf32>
    %69 = arith.mulf %66, %68 : vector<32x256xf32>
    %70 = arith.addf %62, %69 : vector<32x256xf32>
    %c239_i32 = arith.constant 239 : i32
    %71 = tpu.dynamic_rotate %10 by %c239_i32 dim 1 : vector<32x256xf32>, i32 -> vector<32x256xf32>
    %72 = vector.extract_strided_slice %11 {offsets = [8, 0], sizes = [1, 256], strides = [1, 1]} : vector<9x256xf32> to vector<1x256xf32>
    %73 = vector.broadcast %72 : vector<1x256xf32> to vector<32x256xf32>
    %74 = arith.mulf %71, %73 : vector<32x256xf32>
    %75 = vector.extract_strided_slice %1 {offsets = [0, 8], sizes = [32, 1], strides = [1, 1]} : vector<32x9xf32> to vector<32x1xf32>
    %76 = vector.broadcast %75 : vector<32x1xf32> to vector<32x256xf32>
    %77 = arith.mulf %74, %76 : vector<32x256xf32>
    %78 = arith.addf %70, %77 : vector<32x256xf32>
    %c0_11 = arith.constant 0 : index
    %c0_12 = arith.constant 0 : index
    %79 = vector.load %arg5[%c0_11, %c0_12] : memref<32x1xf32, #tpu.memory_space<vmem>>, vector<32x1xf32>
    %80 = vector.broadcast %79 : vector<32x1xf32> to vector<32x256xf32>
    %81 = arith.addf %78, %80 : vector<32x256xf32>
    %cst_13 = arith.constant 0.000000e+00 : f32
    %cst_14 = arith.constant 6.000000e+00 : f32
    %82 = vector.broadcast %cst_13 : f32 to vector<32x256xf32>
    %83 = arith.maximumf %82, %81 : vector<32x256xf32>
    %84 = vector.broadcast %cst_14 : f32 to vector<32x256xf32>
    %85 = arith.minimumf %84, %83 : vector<32x256xf32>
    %c0_15 = arith.constant 0 : index
    %c0_16 = arith.constant 0 : index
    %86 = vector.load %arg6[%c0_15, %c0_16] : memref<16x32xf32, #tpu.memory_space<vmem>>, vector<16x32xf32>
    %cst_17 = arith.constant dense<0.000000e+00> : vector<16x256xf32>
    %87 = tpu.matmul %86, %85, %cst_17 {dimension_numbers = #tpu.dot_dimension_numbers<[1], [0], [0], [1], [0, 0, 1, 1], [], []>} : vector<16x32xf32>, vector<32x256xf32>, vector<16x256xf32> -> vector<16x256xf32>
    %c0_18 = arith.constant 0 : index
    %c0_19 = arith.constant 0 : index
    %88 = vector.load %arg7[%c0_18, %c0_19] : memref<16x1xf32, #tpu.memory_space<vmem>>, vector<16x1xf32>
    %89 = vector.broadcast %88 : vector<16x1xf32> to vector<16x256xf32>
    %90 = arith.addf %87, %89 : vector<16x256xf32>
    %c0_20 = arith.constant 0 : index
    %c0_21 = arith.constant 0 : index
    %91 = vector.load %arg10[%c0_20, %c0_21] : memref<256x1xf32, #tpu.memory_space<vmem>>, vector<256x1xf32>
    %cst_22 = arith.constant dense<0.000000e+00> : vector<16x1xf32>
    %92 = tpu.matmul %90, %91, %cst_22 {dimension_numbers = #tpu.dot_dimension_numbers<[1], [0], [0], [1], [0, 0, 1, 1], [], []>} : vector<16x256xf32>, vector<256x1xf32>, vector<16x1xf32> -> vector<16x1xf32>
    %c0_23 = arith.constant 0 : index
    %c0_24 = arith.constant 0 : index
    %93 = vector.load %arg8[%c0_23, %c0_24] : memref<1x16xf32, #tpu.memory_space<vmem>>, vector<1x16xf32>
    %cst_25 = arith.constant dense<0.000000e+00> : vector<1x1xf32>
    %94 = tpu.matmul %93, %92, %cst_25 {dimension_numbers = #tpu.dot_dimension_numbers<[1], [0], [0], [1], [0, 0, 1, 1], [], []>} : vector<1x16xf32>, vector<16x1xf32>, vector<1x1xf32> -> vector<1x1xf32>
    %cst_26 = arith.constant 0.000000e+00 : f32
    %95 = vector.broadcast %cst_26 : f32 to vector<1x1xf32>
    %96 = arith.maximumf %94, %95 : vector<1x1xf32>
    %c0_27 = arith.constant 0 : index
    %c0_28 = arith.constant 0 : index
    %97 = vector.load %arg9[%c0_27, %c0_28] : memref<16x1xf32, #tpu.memory_space<vmem>>, vector<16x1xf32>
    %cst_29 = arith.constant dense<0.000000e+00> : vector<16x1xf32>
    %98 = tpu.matmul %97, %96, %cst_29 {dimension_numbers = #tpu.dot_dimension_numbers<[1], [0], [0], [1], [0, 0, 1, 1], [], []>} : vector<16x1xf32>, vector<1x1xf32>, vector<16x1xf32> -> vector<16x1xf32>
    %99 = arith.negf %98 : vector<16x1xf32>
    %100 = math.exp %99 : vector<16x1xf32>
    %cst_30 = arith.constant 1.000000e+00 : f32
    %101 = vector.broadcast %cst_30 : f32 to vector<16x1xf32>
    %102 = arith.addf %101, %100 : vector<16x1xf32>
    %103 = arith.divf %101, %102 : vector<16x1xf32>
    %c0_31 = arith.constant 0 : index
    %c0_32 = arith.constant 0 : index
    %104 = vector.load %arg11[%c0_31, %c0_32] : memref<1x256xf32, #tpu.memory_space<vmem>>, vector<1x256xf32>
    %cst_33 = arith.constant dense<0.000000e+00> : vector<16x256xf32>
    %105 = tpu.matmul %103, %104, %cst_33 {dimension_numbers = #tpu.dot_dimension_numbers<[1], [0], [0], [1], [0, 0, 1, 1], [], []>} : vector<16x1xf32>, vector<1x256xf32>, vector<16x256xf32> -> vector<16x256xf32>
    %106 = arith.mulf %90, %105 : vector<16x256xf32>
    %107 = arith.addf %106, %0 : vector<16x256xf32>
    %c0_34 = arith.constant 0 : index
    %c0_35 = arith.constant 0 : index
    %108 = vector.load %arg13[%c0_34, %c0_35] : memref<16x256xf32, #tpu.memory_space<vmem>>, vector<16x256xf32>
    tpu.vector_store %arg13[%c0_34, %c0_35], %107 {strides = array<i32>} : memref<16x256xf32, #tpu.memory_space<vmem>>, vector<16x256xf32>,
    return
  }
  func.func @transform_0(%arg0: i32) -> (i32, i32) {
    %c0_i32 = arith.constant 0 : i32
    %c0_i32_0 = arith.constant 0 : i32
    return %arg0, %c0_i32 : i32, i32
  }
  func.func @transform_1(%arg0: i32) -> (i32, i32) {
    %c0_i32 = arith.constant 0 : i32
    %c0_i32_0 = arith.constant 0 : i32
    %c0_i32_1 = arith.constant 0 : i32
    return %c0_i32, %c0_i32_0 : i32, i32
  }
  func.func @transform_2(%arg0: i32) -> (i32, i32) {
    %c0_i32 = arith.constant 0 : i32
    %c0_i32_0 = arith.constant 0 : i32
    %c0_i32_1 = arith.constant 0 : i32
    return %c0_i32, %c0_i32_0 : i32, i32
  }
  func.func @transform_3(%arg0: i32) -> (i32, i32) {
    %c0_i32 = arith.constant 0 : i32
    %c0_i32_0 = arith.constant 0 : i32
    %c0_i32_1 = arith.constant 0 : i32
    return %c0_i32, %c0_i32_0 : i32, i32
  }
  func.func @transform_4(%arg0: i32) -> (i32, i32) {
    %c0_i32 = arith.constant 0 : i32
    %c0_i32_0 = arith.constant 0 : i32
    %c0_i32_1 = arith.constant 0 : i32
    return %c0_i32, %c0_i32_0 : i32, i32
  }
  func.func @transform_5(%arg0: i32) -> (i32, i32) {
    %c0_i32 = arith.constant 0 : i32
    %c0_i32_0 = arith.constant 0 : i32
    %c0_i32_1 = arith.constant 0 : i32
    return %c0_i32, %c0_i32_0 : i32, i32
  }
  func.func @transform_6(%arg0: i32) -> (i32, i32) {
    %c0_i32 = arith.constant 0 : i32
    %c0_i32_0 = arith.constant 0 : i32
    %c0_i32_1 = arith.constant 0 : i32
    return %c0_i32, %c0_i32_0 : i32, i32
  }
  func.func @transform_7(%arg0: i32) -> (i32, i32) {
    %c0_i32 = arith.constant 0 : i32
    %c0_i32_0 = arith.constant 0 : i32
    %c0_i32_1 = arith.constant 0 : i32
    return %c0_i32, %c0_i32_0 : i32, i32
  }
  func.func @transform_8(%arg0: i32) -> (i32, i32) {
    %c0_i32 = arith.constant 0 : i32
    %c0_i32_0 = arith.constant 0 : i32
    %c0_i32_1 = arith.constant 0 : i32
    return %c0_i32, %c0_i32_0 : i32, i32
  }
  func.func @transform_9(%arg0: i32) -> (i32, i32) {
    %c0_i32 = arith.constant 0 : i32
    %c0_i32_0 = arith.constant 0 : i32
    %c0_i32_1 = arith.constant 0 : i32
    return %c0_i32, %c0_i32_0 : i32, i32
  }
  func.func @transform_10(%arg0: i32) -> (i32, i32) {
    %c0_i32 = arith.constant 0 : i32
    %c0_i32_0 = arith.constant 0 : i32
    %c0_i32_1 = arith.constant 0 : i32
    return %c0_i32, %c0_i32_0 : i32, i32
  }
  func.func @transform_11(%arg0: i32) -> (i32, i32) {
    %c0_i32 = arith.constant 0 : i32
    %c0_i32_0 = arith.constant 0 : i32
    %c0_i32_1 = arith.constant 0 : i32
    return %c0_i32, %c0_i32_0 : i32, i32
  }
  func.func @transform_12(%arg0: i32) -> (i32, i32) {
    %c0_i32 = arith.constant 0 : i32
    %c0_i32_0 = arith.constant 0 : i32
    return %arg0, %c0_i32 : i32, i32
  }
}

</mosaic_0001>

<bundles_post_ra>
// kernel: tpu_custom_call.1
= control target key start
LH: loop header
LB: loop body
LE: loop exit
PB: predicated region body
PF: predicated region fallthrough
CT: control target
= control target key end

     0   :  { %s3235_s0 = inlined_call_operand.vmem [shape: f32[32,256], index: 0, kind: input, shape index: {}]   ;;  %s3236_s1 = inlined_call_operand.vmem [shape: f32[32,16], index: 1, kind: input, shape index: {}]   ;;  %s3237_s2 = inlined_call_operand.vmem [shape: f32[32,1], index: 2, kind: input, shape index: {}]   ;;  %s3238_s3 = inlined_call_operand.vmem [shape: f32[32,9], index: 3, kind: input, shape index: {}]   ;;  %s3239_s4 = inlined_call_operand.vmem [shape: f32[32,1], index: 4, kind: input, shape index: {}]   ;;  %s3240_s5 = inlined_call_operand.vmem [shape: f32[16,32], index: 5, kind: input, shape index: {}]   ;;  %s3241_s6 = inlined_call_operand.vmem [shape: f32[16,1], index: 6, kind: input, shape index: {}]   ;;  %s3242_s7 = inlined_call_operand.vmem [shape: f32[1,16], index: 7, kind: input, shape index: {}]   ;;  %s3243_s8 = inlined_call_operand.vmem [shape: f32[16,1], index: 8, kind: input, shape index: {}]   ;;  %s3244_s9 = inlined_call_operand.vmem [shape: f32[256,1], index: 9, kind: input, shape index: {}]   ;;  %s3245_s10 = inlined_call_operand.vmem [shape: f32[1,256], index: 10, kind: input, shape index: {}]   ;;  %s3246_s11 = inlined_call_operand.vmem [shape: f32[9,256], index: 11, kind: input, shape index: {}]   ;;  %s3247_s12 = inlined_call_operand.hbm [shape: f32[32,256], index: 12, kind: output, shape index: {}]  }
   0x1   :  { %3286 = sst [smem:[#allocation35_spill]] %s3235_s0 }
   0x2   :  { %3287 = sst [smem:[#allocation36_spill]] %s3236_s1 }
   0x3   :  { %3288 = sst [smem:[#allocation37_spill]] %s3237_s2 }
   0x4   :  { %3289 = sst [smem:[#allocation38_spill]] %s3238_s3 }
   0x5   :  { %17 = vsyncpa [#allocation3], 0 }
   0x6   :  { %19 = vsyncpa [#allocation3 + $0x1], 0  ;;  %s2194_s21 = smov 0   ;;  %s2196_s22 = smov 0  }
   0x7   :  { %s2198_s23 = smov 0   ;;  %s2200_s24 = smov 0  }
   0x8 LB: > { %s2215_s25 = sadd.s32 4294967295, %s2105_s24   ;;  %s1804_s26 = sadd.s32 4294967294, %s2105_s24   ;;  %s2105_s24 = sphi %s2200_s24, %s3364_s24   ;;  %s2101_s23 = sphi %s2198_s23, %s3363_s23   ;;  %s2097_s22 = sphi %s2196_s22, %s3362_s22   ;;  %s2093_s21 = sphi %s2194_s21, %s3361_s21  }
   0x9   : > { %s2219_s27 = sadd.s32 1, %s2105_s24   ;;  %s289_s28 = sadd.s32 1, %s2101_s23 }
   0xa   : > { %s286_s29 = ssub.s32 %s2105_s24, %s2219_s27  ;;  %p299_p0 = scmp.ne.s32.totalorder %s2101_s23, %s2097_s22 }
   0xb   : > { %p287_p1 = scmp.eq.s32.totalorder %s286_s29, 0  ;;  %p300_p2 = scmp.eq.s32.totalorder %s2215_s25, 1 }
   0xc   : > { %p305_p3 = scmp.ne.s32.totalorder %s2097_s22, %s2093_s21  ;;  %p306_p4 = scmp.eq.s32.totalorder %s1804_s26, 1 }
   0xd   : > { %s2230_s30 = scalar_select %p287_p1, %s2101_s23, %s289_s28  }
   0xe   : > { %p2232_p5 = por %p300_p2, %p299_p0  ;;  %p2236_p6 = por %p306_p4, %p305_p3 }
   0xf   : > { %p1807_p7 = scmp.ge.s32.totalorder %s2105_s24, 1  ;;  %p367_p8 = scmp.lt.s32.totalorder %s2105_s24, 3 }
  0x11   : > { %p368_p9 = pnand %p1807_p7, %p367_p8 }
  0x13   : > { %371 = sbr.rel (%p368_p9) target bundleno = 1680 (0x690), region = 68 }
  0x1a   : > { %s1809_s15 = sshll.u32 %s2215_s25, 1  ;;  %v3254_v0 = vmov 0.0   ;;  %v2108_v1 = vmov 4   ;;  %s3292_s3 = sld [smem:[#allocation38_spill]]  ;;  %v2109_v4 = vmov 0   ;;  %v2110_v13 = vmov 1  }
  0x1b   : > { %p411_p10 = scmp.lt.s32.totalorder %s1809_s15, 3  ;;  %531 = vmatprep.mubr.f32.mxu0 %v3254_v0  ;;  %2003 = vset.pattern.permute.xlu0 %v2108_v1  ;;  %s3293_s2 = sld [smem:[#allocation37_spill]]  ;;  %vm454_vm0 = vcmask 130048   ;;  %v2111_v17 = vmov 2   ;;  %v2112_v19 = vmov 3   ;;  %v2113_v21 = vmov 5  }
  0x1c   : > { %1323 = vmatprep.mubr.f32.mxu1 %v3254_v0  ;;  %2002 = vset.pattern.permute.xlu1 %v2109_v4  ;;  %s3294_s0 = sld [smem:[#allocation35_spill]]  ;;  %s3295_s1 = sld [smem:[#allocation36_spill]]  ;;  %v2114_v23 = vmov 6   ;;  %v2115_v24 = vmov 7   ;;  %v2116_v25 = vmov 8   ;;  %v1190_v28 = vld [vmem:[%s3239_s4] sm:$0xff] }
  0x1d   : > { %s3366_s15 = smov (!%p411_p10, %s1809_s15), 3  ;;  %v1191_v29 = vld [vmem:[%s3239_s4 + $0x8] sm:$0xff]  ;;  %s3248_s29 = smov 16   ;;  %vm1252_vm9 = vcmask 261120   ;;  %vm2126_vm10 = vmmov 0   ;;  %vm1520_vm11 = vcmask 7168  }
  0x1e   : > { %s1836_s28 = sshll.u32 %s3366_s15, 4  ;;  %s3250_s16 = smov 17   ;;  %vm1527_vm12 = vcmask 1040384  }
  0x1f   : > { %s3251_s18 = smov 15   ;;  %s3252_s19 = smov 111  }
  0x20   : > { %v2247_v2 = vld [vmem:[%s3292_s3] sm:$0xff]  ;;  %v2254_v3 = vld [vmem:[%s3292_s3 + $0x10] sm:$0xff]  ;;  %v2280_v15 = vld [vmem:[%s3292_s3 + $0x8] sm:$0xff]  ;;  %s2121_s15 = smov 1   ;;  %s2122_s20 = smov 127  }
  0x21   : > { %578 = vperm.xlu0 %2003, %v2247_v2   ;;  %v432_v5 = vld [vmem:[%s3293_s2 + $0x10] sm:$0xff]  ;;  %v433_v6 = vld [vmem:[%s3293_s2 + $0x18] sm:$0xff]  ;;  %v430_v26 = vld [vmem:[%s3293_s2] sm:$0xff]  ;;  %s2123_s26 = smov 113  }
  0x22   : > { %446 = vperm.xlu1 %2002, %v432_v5   ;;  %s2263_s17 = scalar_lea.vmem %s3294_s0, %s1836_s28  ;;  %v426_v14 = vld [vmem:[%s3295_s1] sm:$0xff]  ;;  %v427_v16 = vld [vmem:[%s3295_s1 + $0x8] sm:$0xff]  ;;  %v428_v18 = vld [vmem:[%s3295_s1 + $0x10] sm:$0xff]  ;;  %s2124_s28 = smov 112  }
  0x23   : > { %v419_v7 = vld [vmem:[%s2263_s17 + $0x8] sm:$0xff]  ;;  %v421_v8 = vld [vmem:[%s2263_s17 + $0x18] sm:$0xff]  ;;  %v418_v9 = vld [vmem:[%s2263_s17] sm:$0xff] }
  0x24   : > { %v1895_v10 = vpack.c.bf16 %v421_v8, %v419_v7  ;;  %v420_v11 = vld [vmem:[%s2263_s17 + $0x10] sm:$0xff]  ;;  %v429_v20 = vld [vmem:[%s3295_s1 + $0x18] sm:$0xff]  ;;  %v431_v27 = vld [vmem:[%s3293_s2 + $0x8] sm:$0xff] }
  0x25   : > { %588 = vperm.xlu0 %2003, %v2254_v3   ;;  %v1897_v12 = vpack.c.bf16 %v420_v11, %v418_v9  ;;  %v425_v22 = vld [vmem:[%s3292_s3 + $0x18] sm:$0xff] }
  0x26   : > { %451 = vperm.xlu1 %2002, %v433_v6   ;;  %1896 = vmatprep.subr.bf16.mxu0 %v1895_v10 }
  0x27   : > { %1898 = vmatpush1.bf16.msra.mxu0 %v1897_v12 }
  0x29   : > { %2010 = vset.pattern.permute.xlu0 %v2110_v13 }
  0x2a   : > { %729 = vperm.xlu0 %2010, %v2254_v3   ;;  %2004 = vset.pattern.permute.xlu1 %v2108_v1 }
  0x2b   : > { %1812 = vmatmul.mubr.msk.f32.vlgmr.msra.gmra.mrb[0].mxu0 %vm454_vm0, %v426_v14  ;;  %583 = vperm.xlu1 %2004, %v2280_v15  }
  0x2c   : > { %537 = vmatprep.mubr.f32.mxu0 %v3254_v0 }
  0x2e   : > { %2013 = vset.pattern.permute.xlu0 %v2111_v17 }
  0x2f   : > { %802 = vperm.xlu0 %2013, %v2254_v3   ;;  %1813 = vmatmul.mubr.msk.f32.gmra.mrb[2].mxu0 %vm454_vm0, %v427_v16 }
  0x30   : > { %2005 = vset.pattern.permute.xlu1 %v2109_v4  ;;  %543 = vmatprep.mubr.f32.mxu0 %v3254_v0 }
  0x31   : > { %648 = vperm.xlu1 %2005, %v2247_v2  }
  0x33   : > { %2014 = vset.pattern.permute.xlu0 %v2112_v19  ;;  %1814 = vmatmul.mubr.msk.f32.gmra.mrb[4].mxu0 %vm454_vm0, %v428_v18 }
  0x34   : > { %871 = vperm.xlu0 %2014, %v2280_v15   ;;  %549 = vmatprep.mubr.f32.mxu0 %v3254_v0 }
  0x35   : > { %2006 = vset.pattern.permute.xlu1 %v2110_v13 }
  0x36   : > { %721 = vperm.xlu1 %2006, %v2247_v2  }
  0x37   : > { %1815 = vmatmul.mubr.msk.f32.gmra.mrb[6].mxu0 %vm454_vm0, %v429_v20 }
  0x38   : > { %875 = vperm.xlu0 %2014, %v2254_v3  }
  0x3a   : > { %725 = vperm.xlu1 %2006, %v2280_v15  }
  0x3c   : > { %2017 = vset.pattern.permute.xlu0 %v2113_v21 }
  0x3d   : > { %944 = vperm.xlu0 %2017, %v2280_v15  }
  0x3e   : > { %2007 = vset.pattern.permute.xlu1 %v2108_v1 }
  0x3f   : > { %593 = vperm.xlu1 %2007, %v425_v22  }
  0x41   : > { %948 = vperm.xlu0 %2017, %v2254_v3  }
  0x43   : > { %2008 = vset.pattern.permute.xlu1 %v2109_v4 }
  0x44   : > { %656 = vperm.xlu1 %2008, %v2254_v3  }
  0x45   : > { %2020 = vset.pattern.permute.xlu0 %v2114_v23 }
  0x46   : > { %1017 = vperm.xlu0 %2020, %v2280_v15  }
  0x48   : > { %2009 = vset.pattern.permute.xlu1 %v2111_v17 }
  0x49   : > { %794 = vperm.xlu1 %2009, %v2247_v2  }
  0x4a   : > { %1021 = vperm.xlu0 %2020, %v2254_v3  }
  0x4d   : > { %798 = vperm.xlu1 %2009, %v2280_v15  }
  0x4e   : > { %2023 = vset.pattern.permute.xlu0 %v2115_v24 }
  0x4f   : > { %1090 = vperm.xlu0 %2023, %v2280_v15  }
  0x51   : > { %2011 = vset.pattern.permute.xlu1 %v2110_v13 }
  0x52   : > { %733 = vperm.xlu1 %2011, %v425_v22  }
  0x53   : > { %1094 = vperm.xlu0 %2023, %v2254_v3  }
  0x56   : > { %2012 = vset.pattern.permute.xlu1 %v2112_v19 }
  0x57   : > { %2026 = vset.pattern.permute.xlu0 %v2116_v25  ;;  %867 = vperm.xlu1 %2012, %v2247_v2  }
  0x58   : > { %1163 = vperm.xlu0 %2026, %v2280_v15  }
  0x5b   : > { %2015 = vset.pattern.permute.xlu1 %v2111_v17 }
  0x5c   : > { %1171 = vperm.xlu0 %2026, %v425_v22   ;;  %806 = vperm.xlu1 %2015, %v425_v22  }
  0x60   : > { %2029 = vset.pattern.permute.xlu0 %v2109_v4  ;;  %2016 = vset.pattern.permute.xlu1 %v2113_v21 }
  0x61   : > { %436 = vperm.xlu0 %2029, %v430_v26   ;;  %940 = vperm.xlu1 %2016, %v2247_v2  }
  0x65   : > { %441 = vperm.xlu0 %2029, %v431_v27   ;;  %2018 = vset.pattern.permute.xlu1 %v2112_v19 }
  0x66   : > { %879 = vperm.xlu1 %2018, %v425_v22  }
  0x69   : > { %652 = vperm.xlu0 %2029, %v2280_v15  }
  0x6a   : > { %2019 = vset.pattern.permute.xlu1 %v2114_v23 }
  0x6b   : > { %1013 = vperm.xlu1 %2019, %v2247_v2  }
  0x6d   : > { %660 = vperm.xlu0 %2029, %v425_v22  }
  0x6f   : > { %2021 = vset.pattern.permute.xlu1 %v2113_v21 }
  0x70   : > { %952 = vperm.xlu1 %2021, %v425_v22  }
  0x74   : > { %2022 = vset.pattern.permute.xlu1 %v2115_v24 }
  0x75   : > { %1086 = vperm.xlu1 %2022, %v2247_v2  }
  0x79   : > { %2024 = vset.pattern.permute.xlu1 %v2114_v23 }
  0x7a   : > { %1025 = vperm.xlu1 %2024, %v425_v22  }
  0x7e   : > { %2025 = vset.pattern.permute.xlu1 %v2116_v25 }
  0x7f   : > { %1159 = vperm.xlu1 %2025, %v2247_v2  }
  0x83   : > { %2027 = vset.pattern.permute.xlu1 %v2115_v24 }
  0x84   : > { %1098 = vperm.xlu1 %2027, %v425_v22  }
  0x88   : > { %2028 = vset.pattern.permute.xlu1 %v2116_v25 }
  0x89   : > { %1167 = vperm.xlu1 %2028, %v2254_v3  }
  0x8d   : > { %2030 = vset.pattern.permute.xlu1 %v2109_v4 }
  0x8e   : > { %1196 = vperm.xlu1 %2030, %v1190_v28  }
  0x92   : > { %1201 = vperm.xlu1 %2030, %v1191_v29  }
  0xa0   : > { %v2341_v30 = vpop.permute.xlu0 %578 }
  0xa1   : > { %v2363_v41 = vpop.permute.xlu1 %446 }
  0xa4   : > { %v2343_v31 = vpop.permute.xlu0 %588 }
  0xa5   : > { %3296 = vst [vmem:[#allocation5_spill] sm:$0xff] %v2343_v31  ;;  %v2367_v43 = vpop.permute.xlu1 %451 }
  0xa9   : > { %v2345_v32 = vpop.permute.xlu0 %729 }
  0xaa   : > { %3297 = vst [vmem:[#allocation6_spill] sm:$0xff] %v2345_v32  ;;  %v2371_v45 = vpop.permute.xlu1 %583 }
  0xae   : > { %v2347_v33 = vpop.permute.xlu0 %802 }
  0xaf   : > { %3298 = vst [vmem:[#allocation7_spill] sm:$0xff] %v2347_v33 }
  0xb0   : > { %v2375_v47 = vpop.permute.xlu1 %648 }
  0xb3   : > { %v2349_v34 = vpop.permute.xlu0 %871 }
  0xb5   : > { %v2379_v57 = vpop.permute.xlu1 %721 }
  0xb7   : > { %v2351_v35 = vpop.permute.xlu0 %875 }
  0xb8   : > { %3299 = vst [vmem:[#allocation8_spill] sm:$0xff] %v2351_v35 }
  0xb9   : > { %v2389_v61 = vpop.permute.xlu1 %725 }
  0xbc   : > { %v2353_v36 = vpop.permute.xlu0 %944 }
  0xbe   : > { %v2401_v5 = vpop.permute.xlu1 %593 }
  0xbf   : > { %3307 = vst [vmem:[#allocation16_spill] sm:$0xff] %v2401_v5 }
  0xc0   : > { %v2355_v37 = vpop.permute.xlu0 %948 }
  0xc1   : > { %3300 = vst [vmem:[#allocation9_spill] sm:$0xff] %v2355_v37 }
  0xc3   : > { %v2409_v7 = vpop.permute.xlu1 %656 }
  0xc4   : > { %3308 = vst [vmem:[#allocation17_spill] sm:$0xff] %v2409_v7 }
  0xc5   : > { %v2357_v38 = vpop.permute.xlu0 %1017 }
  0xc6   : > { %3301 = vst [vmem:[#allocation10_spill] sm:$0xff] %v2357_v38 }
  0xc8   : > { %v2419_v8 = vpop.permute.xlu1 %794 }
  0xc9   : > { %v2359_v39 = vpop.permute.xlu0 %1021 }
  0xca   : > { %3302 = vst [vmem:[#allocation11_spill] sm:$0xff] %v2359_v39 }
  0xcc   : > { %v2425_v9 = vpop.permute.xlu1 %798 }
  0xce   : > { %v2361_v40 = vpop.permute.xlu0 %1090 }
  0xcf   : > { %3303 = vst [vmem:[#allocation12_spill] sm:$0xff] %v2361_v40 }
  0xd1   : > { %v2431_v11 = vpop.permute.xlu1 %733 }
  0xd2   : > { %v2365_v42 = vpop.permute.xlu0 %1094  ;;  %3309 = vst [vmem:[#allocation18_spill] sm:$0xff] %v2431_v11 }
  0xd3   : > { %3304 = vst [vmem:[#allocation13_spill] sm:$0xff] %v2365_v42 }
  0xd6   : > { %v2441_v13 = vpop.permute.xlu1 %867 }
  0xd7   : > { %v2369_v44 = vpop.permute.xlu0 %1163 }
  0xd8   : > { %3305 = vst [vmem:[#allocation14_spill] sm:$0xff] %v2369_v44 }
  0xdb   : > { %v2373_v46 = vpop.permute.xlu0 %1171  ;;  %v2449_v15 = vpop.permute.xlu1 %806 }
  0xdc   : > { %3306 = vst [vmem:[#allocation15_spill] sm:$0xff] %v2373_v46  ;;  %3310 = vst [vmem:[#allocation19_spill] sm:$0xff] %v2449_v15 }
  0xe0   : > { %v437_v48 = vpop.permute.xlu0 %436  ;;  %v2459_v16 = vpop.permute.xlu1 %940 }
  0xe4   : > { %v442_v62 = vpop.permute.xlu0 %441 }
  0xe5   : > { %v2466_v18 = vpop.permute.xlu1 %879 }
  0xe6   : > { %3311 = vst [vmem:[#allocation20_spill] sm:$0xff] %v2466_v18 }
  0xea   : > { %v2476_v20 = vpop.permute.xlu1 %1013 }
  0xef   : > { %v2485_v24 = vpop.permute.xlu1 %952 }
  0xf0   : > { %3313 = vst [vmem:[#allocation22_spill] sm:$0xff] %v2485_v24  ;;  %v1193_v24 = vld [vmem:[%s3239_s4 + $0x18] sm:$0xff] }
  0xf4   : > { %v2497_v26 = vpop.permute.xlu1 %1086 }
  0xf9   : > { %v2503_v27 = vpop.permute.xlu1 %1025 }
  0xfa   : > { %3315 = vst [vmem:[#allocation24_spill] sm:$0xff] %v2503_v27  ;;  %v2611_v27 = vld [vmem:[%s3246_s11] sm:$0xff] }
  0xfe   : > { %v533_v49 = vpop.f32.mrb[0].mxu0  ;;  %v2515_v29 = vpop.permute.xlu1 %1159 }
  0xff   : > { %v534_v50 = vadd.f32 %v533_v49, %v437_v48  ;;  %v535_v51 = vpop.f32.mrb[1].mxu0  ;;  %3316 = vst [vmem:[#allocation25_spill] sm:$0xff] %v2515_v29 }
 0x100   : > { %v536_v55 = vadd.f32 %v535_v51, %v437_v48 }
 0x101   : > { %v556_v52 = vmax.f32 %v534_v50, 0.0 }
 0x102   : > { %v539_v53 = vpop.f32.mrb[2].mxu0  ;;  %v557_v59 = vmax.f32 %v536_v55, 0.0 }
 0x103   : > { %v2377_v54 = vmin.f32 %v556_v52, 6.0  ;;  %v541_v56 = vpop.f32.mrb[3].mxu0  ;;  %v540_v2 = vadd.f32 %v539_v53, %v442_v62  ;;  %v2523_v49 = vpop.permute.xlu1 %1098 }
 0x104   : > { %v2393_v1 = vmin.f32 %v557_v59, 6.0  ;;  %v542_v10 = vadd.f32 %v541_v56, %v442_v62  ;;  %3318 = vst [vmem:[#allocation27_spill] sm:$0xff] %v2523_v49  ;;  %v1192_v56 = vld [vmem:[%s3239_s4 + $0x10] sm:$0xff]  ;;  %v1241_v59 = vld [vmem:[%s3241_s6 + $0x8] sm:$0xff] }
 0x105   : > { %679 = vrot.lane.b32.xlu0 %v2377_v54, %s3248_s29  ;;  %604 = vrot.lane.b32.xlu1 %v2377_v54, %s3250_s16  ;;  %v558_v4 = vmax.f32 %v540_v2, 0.0  ;;  %v596_v11 = vmul.f32 %v2341_v30, %v2377_v54 }
 0x106   : > { %v545_v58 = vpop.f32.mrb[4].mxu0  ;;  %v559_v12 = vmax.f32 %v542_v10, 0.0 }
 0x107   : > { %v547_v60 = vpop.f32.mrb[5].mxu0  ;;  %v2407_v6 = vmin.f32 %v558_v4, 6.0  ;;  %v546_v17 = vadd.f32 %v545_v58, %v2363_v41 }
 0x108   : > { %v2443_v14 = vmin.f32 %v559_v12, 6.0  ;;  %v548_v22 = vadd.f32 %v547_v60, %v2363_v41  ;;  %v2535_v51 = vpop.permute.xlu1 %1167 }
 0x109   : > { %752 = vrot.lane.b32.xlu0 %v2377_v54, %s3251_s18  ;;  %1117 = vrot.lane.b32.xlu1 %v2377_v54, %s3252_s19  ;;  %v560_v19 = vmax.f32 %v546_v17, 0.0  ;;  %3319 = vst [vmem:[#allocation28_spill] sm:$0xff] %v2535_v51  ;;  %v2616_v51 = vld [vmem:[%s3246_s11 + $0x8] sm:$0xff]  ;;  %v2650_v37 = vmul.f32 %v2371_v45, %v2407_v6 }
 0x10a   : > { %v2391_v63 = vpop.f32.mrb[6].mxu0  ;;  %v561_v23 = vmax.f32 %v548_v22, 0.0 }
 0x10b   : > { %v2395_v3 = vpop.f32.mrb[7].mxu0  ;;  %v2478_v21 = vmin.f32 %v560_v19, 6.0  ;;  %v552_v28 = vadd.f32 %v2391_v63, %v2367_v43 }
 0x10c   : > { %v2491_v25 = vmin.f32 %v561_v23, 6.0  ;;  %v554_v50 = vadd.f32 %v2395_v3, %v2367_v43  ;;  %v2545_v43 = vpop.permute.xlu0 %652  ;;  %v620_v23 = vlaneseq }
 0x10d   : > { %825 = vrot.lane.b32.xlu0 %v2377_v54, %s2121_s15  ;;  %612 = vrot.lane.b32.xlu1 %v2393_v1, %s3250_s16  ;;  %3312 = vst [vmem:[#allocation21_spill] sm:$0xff] %v2478_v21  ;;  %v562_v41 = vmax.f32 %v552_v28, 0.0  ;;  %v2543_v55 = vpop.permute.xlu1 %1196 }
 0x10e   : > { %3314 = vst [vmem:[#allocation23_spill] sm:$0xff] %v2491_v25  ;;  %v563_v52 = vmax.f32 %v554_v50, 0.0  ;;  %3321 = vst [vmem:[#allocation30_spill] sm:$0xff] %v2543_v55  ;;  %v2595_v50 = vshrl.u32 %v620_v23, 7 }
 0x10f   : > { %v2521_v48 = vmin.f32 %v562_v41, 6.0 }
 0x110   : > { %v2541_v53 = vmin.f32 %v563_v52, 6.0  ;;  %v2561_v60 = vpop.permute.xlu0 %660  ;;  %v2604_v0 = vsub.s32 0, %v2595_v50  ;;  %v779_v42 = vsub.s32 2, %v2595_v50 }
 0x111   : > { %898 = vrot.lane.b32.xlu0 %v2377_v54, %s2122_s20  ;;  %1125 = vrot.lane.b32.xlu1 %v2393_v1, %s3252_s19  ;;  %3317 = vst [vmem:[#allocation26_spill] sm:$0xff] %v2521_v48  ;;  %v2556_v58 = vpop.permute.xlu1 %1201  ;;  %3323 = vst [vmem:[#allocation32_spill] sm:$0xff] %v2561_v60 }
 0x112   : > { %3320 = vst [vmem:[#allocation29_spill] sm:$0xff] %v2541_v53  ;;  %3322 = vst [vmem:[#allocation31_spill] sm:$0xff] %v2556_v58  ;;  %v2630_v18 = vrot.slane %v2611_v27, %v2604_v0  ;;  %v2634_v15 = vrot.slane %v2616_v51, %v2604_v0  ;;  %v2683_v32 = vrot.slane %v2616_v51, %v779_v42 }
 0x113   : > { %3328 = vst [vmem:[#allocation33_spill] sm:$0xff] %v2604_v0  ;;  %v852_v0 = vsub.s32 3, %v2595_v50 }
 0x115   : > { %971 = vrot.lane.b32.xlu0 %v2377_v54, %s2123_s26  ;;  %681 = vrot.lane.b32.xlu1 %v2407_v6, %s3248_s29 }
 0x119   : > { %1044 = vrot.lane.b32.xlu0 %v2377_v54, %s2124_s28  ;;  %754 = vrot.lane.b32.xlu1 %v2407_v6, %s3251_s18  ;;  %v2654_v54 = vmul.f32 %v2371_v45, %v2443_v14  ;;  %v925_v45 = vsub.s32 5, %v2595_v50 }
 0x11b   : > { %v2716_v40 = vrot.slane %v2616_v51, %v925_v45 }
 0x11d   : > { %687 = vrot.lane.b32.xlu0 %v2393_v1, %s3248_s29  ;;  %827 = vrot.lane.b32.xlu1 %v2407_v6, %s2121_s15 }
 0x121   : > { %760 = vrot.lane.b32.xlu0 %v2393_v1, %s3251_s18  ;;  %900 = vrot.lane.b32.xlu1 %v2407_v6, %s2122_s20 }
 0x125   : > { %833 = vrot.lane.b32.xlu0 %v2393_v1, %s2121_s15  ;;  %973 = vrot.lane.b32.xlu1 %v2407_v6, %s2123_s26 }
 0x129   : > { %906 = vrot.lane.b32.xlu0 %v2393_v1, %s2122_s20  ;;  %1046 = vrot.lane.b32.xlu1 %v2407_v6, %s2124_s28 }
 0x12d   : > { %979 = vrot.lane.b32.xlu0 %v2393_v1, %s2123_s26  ;;  %689 = vrot.lane.b32.xlu1 %v2443_v14, %s3248_s29 }
 0x131   : > { %1052 = vrot.lane.b32.xlu0 %v2393_v1, %s2124_s28  ;;  %762 = vrot.lane.b32.xlu1 %v2443_v14, %s3251_s18 }
 0x135   : > { %606 = vrot.lane.b32.xlu0 %v2407_v6, %s3250_s16  ;;  %835 = vrot.lane.b32.xlu1 %v2443_v14, %s2121_s15 }
 0x139   : > { %1119 = vrot.lane.b32.xlu0 %v2407_v6, %s3252_s19  ;;  %908 = vrot.lane.b32.xlu1 %v2443_v14, %s2122_s20  ;;  %v2669_v6 = vrot.slane %v2611_v27, %v779_v42 }
 0x13d   : > { %614 = vrot.lane.b32.xlu0 %v2443_v14, %s3250_s16  ;;  %981 = vrot.lane.b32.xlu1 %v2443_v14, %s2123_s26 }
 0x141   : > { %1127 = vrot.lane.b32.xlu0 %v2443_v14, %s3252_s19  ;;  %1054 = vrot.lane.b32.xlu1 %v2443_v14, %s2124_s28  ;;  %v1240_v14 = vld [vmem:[%s3241_s6] sm:$0xff] }
 0x145   : > { %1048 = vrot.lane.b32.xlu0 %v2478_v21, %s2124_s28  ;;  %608 = vrot.lane.b32.xlu1 %v2478_v21, %s3250_s16 }
 0x149   : > { %1121 = vrot.lane.b32.xlu0 %v2478_v21, %s3252_s19  ;;  %683 = vrot.lane.b32.xlu1 %v2478_v21, %s3248_s29 }
 0x14d   : > { %616 = vrot.lane.b32.xlu0 %v2491_v25, %s3250_s16  ;;  %756 = vrot.lane.b32.xlu1 %v2478_v21, %s3251_s18 }
 0x151   : > { %691 = vrot.lane.b32.xlu0 %v2491_v25, %s3248_s29  ;;  %829 = vrot.lane.b32.xlu1 %v2478_v21, %s2121_s15 }
 0x155   : > { %764 = vrot.lane.b32.xlu0 %v2491_v25, %s3251_s18  ;;  %902 = vrot.lane.b32.xlu1 %v2478_v21, %s2122_s20 }
 0x159   : > { %837 = vrot.lane.b32.xlu0 %v2491_v25, %s2121_s15  ;;  %975 = vrot.lane.b32.xlu1 %v2478_v21, %s2123_s26  ;;  %v2705_v21 = vrot.slane %v2611_v27, %v925_v45 }
 0x15d   : > { %910 = vrot.lane.b32.xlu0 %v2491_v25, %s2122_s20  ;;  %983 = vrot.lane.b32.xlu1 %v2491_v25, %s2123_s26 }
 0x161   : > { %1056 = vrot.lane.b32.xlu0 %v2491_v25, %s2124_s28  ;;  %610 = vrot.lane.b32.xlu1 %v2521_v48, %s3250_s16  ;;  %s3325_s16 = smov 17  }
 0x165   : > { %1129 = vrot.lane.b32.xlu0 %v2491_v25, %s3252_s19  ;;  %685 = vrot.lane.b32.xlu1 %v2521_v48, %s3248_s29  ;;  %s3324_s29 = smov 111   ;;  %s3327_s19 = smov 15   ;;  %v2689_v25 = vrot.slane %v2611_v27, %v852_v0 }
 0x169   : > { %977 = vrot.lane.b32.xlu0 %v2521_v48, %s2123_s26  ;;  %758 = vrot.lane.b32.xlu1 %v2521_v48, %s3251_s18  ;;  %s3326_s18 = smov 16  }
 0x16d   : > { %985 = vrot.lane.b32.xlu0 %v2541_v53, %s2123_s26  ;;  %831 = vrot.lane.b32.xlu1 %v2521_v48, %s2121_s15 }
 0x171   : > { %1206 = vperm.xlu0 %2029, %v1192_v56   ;;  %904 = vrot.lane.b32.xlu1 %v2521_v48, %s2122_s20 }
 0x175   : > { %1249 = vperm.xlu0 %2029, %v1241_v59   ;;  %1050 = vrot.lane.b32.xlu1 %v2521_v48, %s2124_s28  ;;  %v2599_v59 = vand.u32 127, %v620_v23  ;;  %v2620_v23 = vsub.s32 1, %v2595_v50 }
 0x177   : > { %v680_v62 = vpop.permute.xlu0 %679  ;;  %v605_v63 = vpop.permute.xlu1 %604  ;;  %vm622_vm1 = vcmp.lt.s32.totalorder %v2599_v59, 17  ;;  %3329 = vst [vmem:[#allocation34_spill] sm:$0xff] %v2620_v23  ;;  %vm695_vm2 = vcmp.lt.s32.totalorder %v2599_v59, 16  ;;  %v2658_v35 = vrot.slane %v2611_v27, %v2620_v23  ;;  %vm768_vm3 = vcmp.lt.s32.totalorder %v2599_v59, 15 }
 0x178   : > { %vm1133_vm4 = vcmp.lt.s32.totalorder %v2599_v59, 111  ;;  %vm841_vm5 = vcmp.lt.s32.totalorder %v2599_v59, 1  ;;  %vm914_vm6 = vcmp.lt.s32.totalorder %v2599_v59, 127  ;;  %vm987_vm7 = vcmp.lt.s32.totalorder %v2599_v59, 113 }
 0x179   : > { %1123 = vrot.lane.b32.xlu1 %v2521_v48, %s3324_s29  ;;  %v597_v48 = vmul.f32 %v2341_v30, %v2393_v1  ;;  %v2664_v30 = vrot.slane %v2616_v51, %v2620_v23  ;;  %vm1060_vm8 = vcmp.lt.s32.totalorder %v2599_v59, 112 }
 0x17b   : > { %v2567_v2 = vpop.permute.xlu0 %752  ;;  %v2569_v3 = vpop.permute.xlu1 %1117 }
 0x17d   : > { %618 = vrot.lane.b32.xlu1 %v2541_v53, %s3325_s16 }
 0x17f   : > { %v2573_v4 = vpop.permute.xlu0 %825  ;;  %v613_v10 = vpop.permute.xlu1 %612 }
 0x180   : > { %v623_v60 = vsel %vm622_vm1, %v605_v63, %v613_v10  ;;  %v627_v39 = vsel %vm622_vm1, %v613_v10, %v605_v63 }
 0x181   : > { %693 = vrot.lane.b32.xlu1 %v2541_v53, %s3326_s18  ;;  %v640_v63 = vmul.f32 %v2634_v15, %v623_v60 }
 0x183   : > { %v2577_v12 = vpop.permute.xlu0 %898  ;;  %v2579_v17 = vpop.permute.xlu1 %1125 }
 0x185   : > { %766 = vrot.lane.b32.xlu1 %v2541_v53, %s3327_s19  ;;  %s407_s19 = sand.u32 1, %s2097_s22  }
 0x187   : > { %v2583_v19 = vpop.permute.xlu0 %971  ;;  %v2585_v22 = vpop.permute.xlu1 %681 }
 0x189   : > { %839 = vrot.lane.b32.xlu1 %v2541_v53, %s2121_s15  ;;  %s1838_s15 = sshll.u32 %s2215_s25, 9  ;;  %s3193_s25 = scalar_lea.sflag [#allocation3], %s407_s19 }
 0x18a   : > { %s3191_s0 = scalar_lea.hbm %s3247_s12, %s1838_s15 }
 0x18b   : > { %v2589_v28 = vpop.permute.xlu0 %1044  ;;  %v2591_v41 = vpop.permute.xlu1 %754 }
 0x18d   : > { %912 = vrot.lane.b32.xlu1 %v2541_v53, %s2122_s20 }
 0x18f   : > { %v688_v52 = vpop.permute.xlu0 %687  ;;  %v2597_v56 = vpop.permute.xlu1 %827 }
 0x190   : > { %v700_v1 = vsel %vm695_vm2, %v688_v52, %v680_v62  ;;  %v696_v10 = vsel %vm695_vm2, %v680_v62, %v688_v52  ;;  %v2697_v52 = vrot.slane %v2616_v51, %v852_v0 }
 0x191   : > { %1058 = vrot.lane.b32.xlu1 %v2541_v53, %s2124_s28  ;;  %v712_v60 = vmul.f32 %v2658_v35, %v700_v1  ;;  %v713_v42 = vmul.f32 %v2664_v30, %v696_v10  ;;  %v1071_v1 = vsub.s32 7, %v2595_v50  ;;  %s2127_s28 = smov [#allocation2]  }
 0x193   : > { %v761_v46 = vpop.permute.xlu0 %760  ;;  %v2606_v49 = vpop.permute.xlu1 %900  ;;  %v737_v45 = vmul.f32 %v2379_v57, %v713_v42  ;;  %v2738_v44 = vrot.slane %v2611_v27, %v1071_v1 }
 0x194   : > { %v773_v58 = vsel %vm768_vm3, %v761_v46, %v2567_v2  ;;  %v769_v62 = vsel %vm768_vm3, %v2567_v2, %v761_v46  ;;  %v664_v46 = vmul.f32 %v2375_v47, %v640_v63 }
 0x195   : > { %1131 = vrot.lane.b32.xlu1 %v2541_v53, %s3324_s29  ;;  %v785_v0 = vmul.f32 %v2669_v6, %v773_v58  ;;  %v786_v55 = vmul.f32 %v2683_v32, %v769_v62  ;;  %s1808_s29 = sshll.u32 %s407_s19, 5 }
 0x196   : > { %v672_v62 = vadd.f32 %v664_v46, %v597_v48  ;;  %v2752_v48 = vrot.slane %v2616_v51, %v1071_v1  ;;  %s409_s1 = scalar_lea.vmem [#allocation2], %s1808_s29  ;;  %s2047_s29 = sshll.u32 %s2127_s28, 4  ;;  %s2048_s29 = int_to_ptr.vmem [resolvable:$false] %s2047_s29 }
 0x197   : > { %v834_v53 = vpop.permute.xlu0 %833  ;;  %v2639_v5 = vpop.permute.xlu1 %973  ;;  %s1742_s2 = sshll.u32 %s409_s1, 4  ;;  %s2049_s3 = scalar_lea.vmem %s2048_s29, 1024  ;;  %s3184_s2 = int_to_ptr.vmem [resolvable:$true] %s1742_s2 }
 0x198   : > { %v846_v31 = vsel %vm841_vm5, %v834_v53, %v2573_v4  ;;  %v842_v2 = vsel %vm841_vm5, %v2573_v4, %v834_v53  ;;  %s2043_s16 = scalar_lea.vmem %s3184_s2, 512  ;;  %p2050_p0 = scmp.lt.s32.totalorder %s3184_s2, %s2048_s29 }
 0x199   : > { %1211 = vperm.xlu1 %2030, %v1193_v24   ;;  %v639_v24 = vmul.f32 %v2630_v18, %v627_v39  ;;  %v998_v39 = vsub.s32 6, %v2595_v50  ;;  %v858_v58 = vmul.f32 %v2689_v25, %v846_v31  ;;  %v809_v31 = vmul.f32 %v2419_v8, %v785_v0  ;;  %p2044_p11 = scmp.ne.s32.totalorder %s3184_s2, %s2043_s16  ;;  %p2051_p1 = scmp.lt.s32.totalorder %s2049_s3, %s2043_s16 }
 0x19b   : > { %v907_v23 = vpop.permute.xlu0 %906  ;;  %v2680_v33 = vpop.permute.xlu1 %1046  ;;  %v663_v7 = vmul.f32 %v2375_v47, %v639_v24  ;;  %v2720_v50 = vrot.slane %v2611_v27, %v998_v39  ;;  %v736_v47 = vmul.f32 %v2379_v57, %v712_v60  ;;  %v859_v24 = vmul.f32 %v2697_v52, %v842_v2  ;;  %p2045_p12 = pnand %p2044_p11, %p2232_p5  ;;  %p2052_p2 = por %p2051_p1, %p2050_p0 }
 0x19c   : > { %v915_v53 = vsel %vm914_vm6, %v2577_v12, %v907_v23  ;;  %v919_v4 = vsel %vm914_vm6, %v907_v23, %v2577_v12  ;;  %v2733_v63 = vrot.slane %v2616_v51, %v998_v39  ;;  %v810_v12 = vmul.f32 %v2419_v8, %v786_v55 }
 0x19d   : > { %1244 = vperm.xlu1 %2030, %v1240_v14   ;;  %v671_v60 = vadd.f32 %v663_v7, %v596_v11  ;;  %v931_v57 = vmul.f32 %v2705_v21, %v915_v53  ;;  %v932_v23 = vmul.f32 %v2716_v40, %v919_v4  ;;  %v1134_v7 = vsel %vm1133_vm4, %v2569_v3, %v2579_v17  ;;  %p2046_p13 = pneg %p2045_p12 }
 0x19e   : > { %v882_v27 = vmul.f32 %v2441_v13, %v858_v58  ;;  %v745_v8 = vadd.f32 %v737_v45, %v672_v62  ;;  %v883_v55 = vmul.f32 %v2441_v13, %v859_v24  ;;  %v1138_v4 = vsel %vm1133_vm4, %v2579_v17, %v2569_v3  ;;  %v1352_v62 = vld [vmem:[%s3244_s9 + $0x80] sm:$0xff] }
 0x19f   : > { %v980_v14 = vpop.permute.xlu0 %979  ;;  %v690_v10 = vpop.permute.xlu1 %689  ;;  %v744_v11 = vadd.f32 %v736_v47, %v671_v60  ;;  %v955_v53 = vmul.f32 %v2459_v16, %v931_v57  ;;  %v1354_v57 = vld [vmem:[%s3244_s9 + $0x90] sm:$0xff]  ;;  %p2053_p3 = pnand %p2052_p2, %p2046_p13 }
 0x1a0   : > { %v988_v39 = vsel %vm987_vm7, %v2583_v19, %v980_v14  ;;  %v992_v42 = vsel %vm987_vm7, %v980_v14, %v2583_v19  ;;  %v701_v46 = vsel %vm695_vm2, %v690_v10, %v2585_v22  ;;  %v697_v47 = vsel %vm695_vm2, %v2585_v22, %v690_v10  ;;  %v2771_v19 = vld [vmem:[%s3246_s11 + $0x10] ss:$0 sm:$0xff]  ;;  %v2776_v14 = vld [vmem:[%s3246_s11 + $0x18] ss:$0 sm:$0xff] }
 0x1a1   : > { %v817_v0 = vadd.f32 %v809_v31, %v744_v11  ;;  %v1004_v2 = vmul.f32 %v2720_v50, %v988_v39  ;;  %v818_v58 = vadd.f32 %v810_v12, %v745_v8  ;;  %v956_v22 = vmul.f32 %v2459_v16, %v932_v23  ;;  %v1353_v16 = vld [vmem:[%s3244_s9 + $0x88] sm:$0xff]  ;;  %v1355_v23 = vld [vmem:[%s3244_s9 + $0x98] sm:$0xff] }
 0x1a2   : > { %v1005_v24 = vmul.f32 %v2733_v63, %v992_v42  ;;  %v714_v60 = vmul.f32 %v2658_v35, %v701_v46  ;;  %v715_v3 = vmul.f32 %v2664_v30, %v697_v47  ;;  %v1907_v31 = vpack.c.bf16 %v1353_v16, %v1352_v62  ;;  %v1337_v12 = vld [vmem:[%s3244_s9 + $0x8] sm:$0xff]  ;;  %v1338_v46 = vld [vmem:[%s3244_s9 + $0x10] sm:$0xff]  ;;  %v1356_v47 = vld [vmem:[%s3244_s9 + $0xa0] sm:$0xff] }
 0x1a3   : > { %v1053_v38 = vpop.permute.xlu0 %1052  ;;  %v763_v29 = vpop.permute.xlu1 %762  ;;  %v890_v45 = vadd.f32 %v882_v27, %v817_v0  ;;  %v1028_v39 = vmul.f32 %v2476_v20, %v1004_v2  ;;  %v1911_v42 = vpack.c.bf16 %v1355_v23, %v1354_v57  ;;  %v1339_v0 = vld [vmem:[%s3244_s9 + $0x18] sm:$0xff]  ;;  %v2823_v2 = vmul.f32 %v2771_v19, %v1134_v7  ;;  %v1357_v62 = vld [vmem:[%s3244_s9 + $0xa8] sm:$0xff] }
 0x1a4   : > { %v1061_v51 = vsel %vm1060_vm8, %v2589_v28, %v1053_v38  ;;  %v1065_v10 = vsel %vm1060_vm8, %v1053_v38, %v2589_v28  ;;  %v1336_v38 = vld [vmem:[%s3244_s9] sm:$0xff]  ;;  %v891_v28 = vadd.f32 %v883_v55, %v818_v58  ;;  %1908 = vmatprep.subr.bf16.mxu0 %v1907_v31  ;;  %v1029_v16 = vmul.f32 %v2476_v20, %v1005_v24  ;;  %v1341_v24 = vld [vmem:[%s3244_s9 + $0x28] sm:$0xff]  ;;  %v1359_v31 = vld [vmem:[%s3244_s9 + $0xb8] sm:$0xff] }
 0x1a5   : > { %v1077_v17 = vmul.f32 %v2738_v44, %v1061_v51  ;;  %v1078_v11 = vmul.f32 %v2752_v48, %v1065_v10  ;;  %v1909_v55 = vpack.c.bf16 %v1337_v12, %v1336_v38  ;;  %v2826_v51 = vmul.f32 %v2776_v14, %v1138_v4  ;;  %v1340_v20 = vld [vmem:[%s3244_s9 + $0x20] sm:$0xff] }
 0x1a6   : > { %v963_v58 = vadd.f32 %v955_v53, %v890_v45  ;;  %v964_v10 = vadd.f32 %v956_v22, %v891_v28  ;;  %v738_v38 = vmul.f32 %v2389_v61, %v714_v60  ;;  %v770_v12 = vsel %vm768_vm3, %v2591_v41, %v763_v29 }
 0x1a7   : > { %v607_v13 = vpop.permute.xlu0 %606  ;;  %v836_v1 = vpop.permute.xlu1 %835  ;;  %v774_v7 = vsel %vm768_vm3, %v763_v29, %v2591_v41  ;;  %1910 = vmatpush3.bf16.msra.mxu0 %v1909_v55  ;;  %v739_v53 = vmul.f32 %v2389_v61, %v715_v3  ;;  %v1101_v22 = vmul.f32 %v2497_v26, %v1077_v17  ;;  %v1913_v4 = vpack.c.bf16 %v1339_v0, %v1338_v46  ;;  %v1358_v17 = vld [vmem:[%s3244_s9 + $0xb0] sm:$0xff] }
 0x1a8   : > { %1912 = vmatprep.subr.bf16.mxu0 %v1911_v42  ;;  %v1915_v45 = vpack.c.bf16 %v1357_v62, %v1356_v47  ;;  %v1036_v60 = vadd.f32 %v1028_v39, %v963_v58  ;;  %v1102_v28 = vmul.f32 %v2497_v26, %v1078_v11  ;;  %v843_v61 = vsel %vm841_vm5, %v2597_v56, %v836_v1  ;;  %v1342_v58 = vld [vmem:[%s3244_s9 + $0x30] sm:$0xff] }
 0x1a9   : > { %v847_v29 = vsel %vm841_vm5, %v836_v1, %v2597_v56  ;;  %v787_v26 = vmul.f32 %v2669_v6, %v774_v7  ;;  %v788_v57 = vmul.f32 %v2683_v32, %v770_v12  ;;  %v1037_v1 = vadd.f32 %v1029_v16, %v964_v10 }
 0x1aa   : > { %v1917_v55 = vpack.c.bf16 %v1341_v24, %v1340_v20  ;;  %v2868_v42 = vadd.f32 %v1101_v22, %v1036_v60  ;;  %v860_v46 = vmul.f32 %v2689_v25, %v847_v29  ;;  %v861_v0 = vmul.f32 %v2697_v52, %v843_v61 }
 0x1ab   : > { %v2811_v27 = vpop.permute.xlu0 %1119  ;;  %v909_v8 = vpop.permute.xlu1 %908  ;;  %1914 = vmatpush3.bf16.msra.mxu0 %v1913_v4  ;;  %v1919_v47 = vpack.c.bf16 %v1359_v31, %v1358_v17  ;;  %v1360_v4 = vld [vmem:[%s3244_s9 + $0xc0] sm:$0xff]  ;;  %v1110_v20 = vadd.f32 %v1102_v28, %v1037_v1  ;;  %v811_v24 = vmul.f32 %v2425_v9, %v787_v26  ;;  %v812_v60 = vmul.f32 %v2425_v9, %v788_v57  ;;  %v1363_v1 = vld [vmem:[%s3244_s9 + $0xd8] sm:$0xff] }
 0x1ac   : > { %1916 = vmatprep.subr.bf16.mxu0 %v1915_v45  ;;  %v916_v10 = vsel %vm914_vm6, %v2606_v49, %v909_v8  ;;  %v920_v62 = vsel %vm914_vm6, %v909_v8, %v2606_v49  ;;  %v1361_v45 = vld [vmem:[%s3244_s9 + $0xc8] sm:$0xff]  ;;  %v884_v28 = vmul.f32 %v2349_v34, %v860_v46 }
 0x1ad   : > { %v934_v9 = vmul.f32 %v2716_v40, %v920_v62  ;;  %v1923_v17 = vpack.c.bf16 %v1361_v45, %v1360_v4  ;;  %v1347_v62 = vld [vmem:[%s3244_s9 + $0x58] sm:$0xff]  ;;  %v1364_v4 = vld [vmem:[%s3244_s9 + $0xe0] sm:$0xff]  ;;  %v1365_v45 = vld [vmem:[%s3244_s9 + $0xe8] sm:$0xff] }
 0x1af   : > { %v615_v41 = vpop.permute.xlu0 %614  ;;  %v982_v3 = vpop.permute.xlu1 %981  ;;  %1918 = vmatpush3.bf16.msra.mxu0 %v1917_v55 }
 0x1b0   : > { %v624_v23 = vsel %vm622_vm1, %v607_v13, %v615_v41  ;;  %v628_v56 = vsel %vm622_vm1, %v615_v41, %v607_v13  ;;  %v1343_v13 = vld [vmem:[%s3244_s9 + $0x38] sm:$0xff]  ;;  %v989_v49 = vsel %vm987_vm7, %v2639_v5, %v982_v3  ;;  %v993_v61 = vsel %vm987_vm7, %v982_v3, %v2639_v5  ;;  %1920 = vmatprep.subr.bf16.mxu0 %v1919_v47 }
 0x1b1   : > { %v641_v39 = vmul.f32 %v2630_v18, %v628_v56  ;;  %v642_v11 = vmul.f32 %v2634_v15, %v624_v23  ;;  %v1921_v29 = vpack.c.bf16 %v1343_v13, %v1342_v58  ;;  %v933_v41 = vmul.f32 %v2705_v21, %v916_v10  ;;  %v1362_v56 = vld [vmem:[%s3244_s9 + $0xd0] sm:$0xff] }
 0x1b2   : > { %v885_v5 = vmul.f32 %v2349_v34, %v861_v0  ;;  %v1007_v34 = vmul.f32 %v2733_v63, %v993_v61  ;;  %v958_v58 = vmul.f32 %v2353_v36, %v934_v9  ;;  %v1927_v10 = vpack.c.bf16 %v1363_v1, %v1362_v56  ;;  %v3333_v56 = vld [vmem:[#allocation12_spill] sm:$0xff] }
 0x1b3   : > { %v665_v16 = vmul.f32 %v2545_v43, %v641_v39  ;;  %v666_v12 = vmul.f32 %v2545_v43, %v642_v11  ;;  %v1128_v7 = vpop.permute.xlu0 %1127  ;;  %v1055_v22 = vpop.permute.xlu1 %1054  ;;  %v1006_v39 = vmul.f32 %v2720_v50, %v989_v49  ;;  %1922 = vmatpush3.bf16.msra.mxu0 %v1921_v29  ;;  %v957_v47 = vmul.f32 %v2353_v36, %v933_v41 }
 0x1b4   : > { %v1135_v26 = vsel %vm1133_vm4, %v2811_v27, %v1128_v7  ;;  %v1139_v46 = vsel %vm1133_vm4, %v1128_v7, %v2811_v27  ;;  %1924 = vmatprep.subr.bf16.mxu0 %v1923_v17  ;;  %v1348_v17 = vld [vmem:[%s3244_s9 + $0x60] sm:$0xff] }
 0x1b5   : > { %v673_v43 = vadd.f32 %v665_v16, %v2650_v37  ;;  %v674_v8 = vadd.f32 %v666_v12, %v2654_v54  ;;  %v1344_v37 = vld [vmem:[%s3244_s9 + $0x40] sm:$0xff]  ;;  %v1345_v54 = vld [vmem:[%s3244_s9 + $0x48] sm:$0xff]  ;;  %v1152_v13 = vmul.f32 %v2771_v19, %v1135_v26  ;;  %v1153_v61 = vmul.f32 %v2776_v14, %v1139_v46 }
 0x1b6   : > { %v1925_v0 = vpack.c.bf16 %v1345_v54, %v1344_v37  ;;  %v3332_v37 = vld [vmem:[#allocation14_spill] sm:$0xff] }
 0x1b7   : > { %v746_v3 = vadd.f32 %v738_v38, %v673_v43  ;;  %v747_v31 = vadd.f32 %v739_v53, %v674_v8  ;;  %v2915_v57 = vpop.permute.xlu0 %1048  ;;  %v609_v23 = vpop.permute.xlu1 %608  ;;  %v1062_v38 = vsel %vm1060_vm8, %v2680_v33, %v1055_v22  ;;  %v1066_v53 = vsel %vm1060_vm8, %v1055_v22, %v2680_v33  ;;  %v1346_v33 = vld [vmem:[%s3244_s9 + $0x50] sm:$0xff]  ;;  %v3331_v43 = vld [vmem:[#allocation10_spill] sm:$0xff] }
 0x1b8   : > { %v1079_v12 = vmul.f32 %v2738_v44, %v1062_v38  ;;  %v1080_v7 = vmul.f32 %v2752_v48, %v1066_v53  ;;  %v1030_v8 = vmul.f32 %v3331_v43, %v1006_v39  ;;  %v1031_v41 = vmul.f32 %v3331_v43, %v1007_v34  ;;  %1926 = vmatpush3.bf16.msra.mxu0 %v1925_v0  ;;  %v3338_v43 = vld [vmem:[#allocation23_spill] sm:$0xff] }
 0x1b9   : > { %v819_v11 = vadd.f32 %v811_v24, %v746_v3  ;;  %v820_v55 = vadd.f32 %v812_v60, %v747_v31  ;;  %v3330_v24 = vld [vmem:[#allocation25_spill] sm:$0xff]  ;;  %v1929_v9 = vpack.c.bf16 %v1347_v62, %v1346_v33  ;;  %1928 = vmatprep.subr.bf16.mxu0 %v1927_v10  ;;  %v1931_v3 = vpack.c.bf16 %v1365_v45, %v1364_v4 }
 0x1ba   : > { %v1174_v60 = vmul.f32 %v3330_v24, %v2823_v2  ;;  %v1175_v49 = vmul.f32 %v3330_v24, %v2826_v51  ;;  %v1349_v2 = vld [vmem:[%s3244_s9 + $0x68] sm:$0xff]  ;;  %v1176_v51 = vmul.f32 %v3332_v37, %v1152_v13  ;;  %v1103_v1 = vmul.f32 %v3333_v56, %v1079_v12  ;;  %v3335_v33 = vld [vmem:[#allocation17_spill] sm:$0xff] }
 0x1bb   : > { %v892_v16 = vadd.f32 %v884_v28, %v819_v11  ;;  %v893_v27 = vadd.f32 %v885_v5, %v820_v55  ;;  %v2945_v22 = vpop.permute.xlu0 %1121  ;;  %v684_v36 = vpop.permute.xlu1 %683  ;;  %v1104_v39 = vmul.f32 %v3333_v56, %v1080_v7  ;;  %v1177_v53 = vmul.f32 %v3332_v37, %v1153_v61  ;;  %v3336_v24 = vld [vmem:[#allocation21_spill] sm:$0xff] }
 0x1bc   : > { %v1183_v54 = vadd.f32 %v1175_v49, %v1110_v20  ;;  %v1182_v5 = vadd.f32 %v1174_v60, %v2868_v42  ;;  %v1933_v55 = vpack.c.bf16 %v1349_v2, %v1348_v17  ;;  %1930 = vmatpush3.bf16.msra.mxu0 %v1929_v9  ;;  %v3337_v60 = vld [vmem:[#allocation5_spill] sm:$0xff] }
 0x1bd   : > { %v965_v29 = vadd.f32 %v957_v47, %v892_v16  ;;  %v966_v28 = vadd.f32 %v958_v58, %v893_v27  ;;  %v3334_v58 = vld [vmem:[#allocation30_spill] sm:$0xff]  ;;  %1932 = vmatprep.subr.bf16.mxu0 %v1931_v3  ;;  %v600_v49 = vmul.f32 %v3337_v60, %v3336_v24 }
 0x1be   : > { %v1215_v13 = vadd.f32 %v3334_v58, %v1183_v54  ;;  %v1214_v10 = vadd.f32 %v3334_v58, %v1182_v5 }
 0x1bf   : > { %v1038_v31 = vadd.f32 %v1030_v8, %v965_v29  ;;  %v1039_v26 = vadd.f32 %v1031_v41, %v966_v28  ;;  %v617_v34 = vpop.permute.xlu0 %616  ;;  %v757_v38 = vpop.permute.xlu1 %756  ;;  %v601_v8 = vmul.f32 %v3337_v60, %v3338_v43  ;;  %v3339_v28 = vld [vmem:[#allocation31_spill] sm:$0xff] }
 0x1c0   : > { %v625_v11 = vsel %vm622_vm1, %v609_v23, %v617_v34  ;;  %v629_v20 = vsel %vm622_vm1, %v617_v34, %v609_v23  ;;  %1934 = vmatpush3.bf16.msra.mxu0 %v1933_v55  ;;  %v1223_v9 = vmax.f32 %v1215_v13, 0.0  ;;  %v1222_v2 = vmax.f32 %v1214_v10, 0.0 }
 0x1c1   : > { %v1111_v42 = vadd.f32 %v1103_v1, %v1038_v31  ;;  %v1112_v46 = vadd.f32 %v1104_v39, %v1039_v26  ;;  %v643_v0 = vmul.f32 %v2630_v18, %v629_v20  ;;  %v644_v47 = vmul.f32 %v2634_v15, %v625_v11 }
 0x1c2   : > { %v1231_v55 = vmin.f32 %v1223_v9, 6.0 }
 0x1c3   : > { %v667_v62 = vmul.f32 %v3335_v33, %v643_v0  ;;  %v668_v16 = vmul.f32 %v3335_v33, %v644_v47  ;;  %v692_v27 = vpop.permute.xlu0 %691  ;;  %v830_v12 = vpop.permute.xlu1 %829  ;;  %v1185_v23 = vadd.f32 %v1177_v53, %v1112_v46  ;;  %v1184_v7 = vadd.f32 %v1176_v51, %v1111_v42 }
 0x1c4   : > { %v698_v4 = vsel %vm695_vm2, %v684_v36, %v692_v27  ;;  %v702_v45 = vsel %vm695_vm2, %v692_v27, %v684_v36  ;;  %v3340_v36 = vld [vmem:[#allocation6_spill] sm:$0xff]  ;;  %v1230_v46 = vmin.f32 %v1222_v2, 6.0 }
 0x1c5   : > { %v716_v61 = vmul.f32 %v2658_v35, %v702_v45  ;;  %v717_v29 = vmul.f32 %v2664_v30, %v698_v4  ;;  %v1217_v41 = vadd.f32 %v3339_v28, %v1185_v23  ;;  %v1216_v17 = vadd.f32 %v3339_v28, %v1184_v7  ;;  %v3342_v4 = vld [vmem:[#allocation8_spill] sm:$0xff] }
 0x1c6   : > { %v675_v37 = vadd.f32 %v667_v62, %v600_v49  ;;  %v676_v51 = vadd.f32 %v668_v16, %v601_v8  ;;  %v3341_v62 = vld [vmem:[#allocation7_spill] sm:$0xff] }
 0x1c7   : > { %v740_v54 = vmul.f32 %v3340_v36, %v716_v61  ;;  %v741_v5 = vmul.f32 %v3340_v36, %v717_v29  ;;  %v765_v3 = vpop.permute.xlu0 %764  ;;  %v903_v31 = vpop.permute.xlu1 %902  ;;  %v1225_v1 = vmax.f32 %v1217_v41, 0.0  ;;  %v1224_v39 = vmax.f32 %v1216_v17, 0.0  ;;  %v3343_v36 = vld [vmem:[#allocation9_spill] sm:$0xff] }
 0x1c8   : > { %v771_v26 = vsel %vm768_vm3, %v757_v38, %v765_v3  ;;  %v775_v56 = vsel %vm768_vm3, %v765_v3, %v757_v38 }
 0x1c9   : > { %v748_v34 = vadd.f32 %v740_v54, %v675_v37  ;;  %v749_v53 = vadd.f32 %v741_v5, %v676_v51  ;;  %v789_v11 = vmul.f32 %v2669_v6, %v775_v56  ;;  %v790_v20 = vmul.f32 %v2683_v32, %v771_v26 }
 0x1ca   : > { %v1233_v42 = vmin.f32 %v1225_v1, 6.0  ;;  %v1232_v0 = vmin.f32 %v1224_v39, 6.0  ;;  %v3344_v1 = vld [vmem:[#allocation11_spill] sm:$0xff] }
 0x1cb   : > { %v838_v47 = vpop.permute.xlu0 %837  ;;  %v976_v58 = vpop.permute.xlu1 %975  ;;  %v813_v16 = vmul.f32 %v3341_v62, %v789_v11  ;;  %v814_v27 = vmul.f32 %v3341_v62, %v790_v20 }
 0x1cc   : > { %v844_v13 = vsel %vm841_vm5, %v830_v12, %v838_v47  ;;  %v848_v38 = vsel %vm841_vm5, %v838_v47, %v830_v12  ;;  %v1899_v10 = vpack.c.bf16 %v1233_v42, %v1231_v55  ;;  %v1901_v33 = vpack.c.bf16 %v1232_v0, %v1230_v46 }
 0x1cd   : > { %v862_v23 = vmul.f32 %v2689_v25, %v848_v38  ;;  %v863_v7 = vmul.f32 %v2697_v52, %v844_v13  ;;  %v821_v29 = vadd.f32 %v813_v16, %v748_v34  ;;  %v822_v28 = vadd.f32 %v814_v27, %v749_v53 }
 0x1ce   : > { %1900 = vmatprep.subr.bf16.mxu1 %v1899_v10 }
 0x1cf   : > { %v886_v45 = vmul.f32 %v3342_v4, %v862_v23  ;;  %v887_v24 = vmul.f32 %v3342_v4, %v863_v7  ;;  %1902 = vmatpush1.bf16.msra.mxu1 %v1901_v33  ;;  %v911_v60 = vpop.permute.xlu0 %910  ;;  %v984_v49 = vpop.permute.xlu1 %983 }
 0x1d0   : > { %v917_v12 = vsel %vm914_vm6, %v903_v31, %v911_v60  ;;  %v921_v43 = vsel %vm914_vm6, %v911_v60, %v903_v31  ;;  %v990_v8 = vsel %vm987_vm7, %v976_v58, %v984_v49  ;;  %v994_v61 = vsel %vm987_vm7, %v984_v49, %v976_v58 }
 0x1d1   : > { %v935_v41 = vmul.f32 %v2705_v21, %v917_v12  ;;  %v936_v9 = vmul.f32 %v2716_v40, %v921_v43  ;;  %v1008_v17 = vmul.f32 %v2720_v50, %v990_v8  ;;  %v1009_v2 = vmul.f32 %v2733_v63, %v994_v61 }
 0x1d2   : > { %v894_v37 = vadd.f32 %v886_v45, %v821_v29  ;;  %v895_v51 = vadd.f32 %v887_v24, %v822_v28 }
 0x1d3   : > { %v959_v54 = vmul.f32 %v3343_v36, %v935_v41  ;;  %v960_v5 = vmul.f32 %v3343_v36, %v936_v9  ;;  %v1057_v3 = vpop.permute.xlu0 %1056  ;;  %v611_v31 = vpop.permute.xlu1 %610  ;;  %v1032_v39 = vmul.f32 %v3344_v1, %v1008_v17  ;;  %v1033_v34 = vmul.f32 %v3344_v1, %v1009_v2  ;;  %v3348_v36 = vld [vmem:[#allocation29_spill] sm:$0xff] }
 0x1d5   : > { %v967_v26 = vadd.f32 %v959_v54, %v894_v37  ;;  %v968_v56 = vadd.f32 %v960_v5, %v895_v51  ;;  %v3346_v37 = vld [vmem:[#allocation26_spill] sm:$0xff]  ;;  %v3347_v51 = vld [vmem:[#allocation16_spill] sm:$0xff] }
 0x1d7   : > { %v3027_v53 = vadd.f32 %v1032_v39, %v967_v26  ;;  %v3029_v11 = vadd.f32 %v1033_v34, %v968_v56  ;;  %v1130_v20 = vpop.permute.xlu0 %1129  ;;  %v686_v55 = vpop.permute.xlu1 %685  ;;  %v1063_v39 = vsel %vm1060_vm8, %v2915_v57, %v1057_v3  ;;  %v1067_v34 = vsel %vm1060_vm8, %v1057_v3, %v2915_v57  ;;  %v3351_v3 = vld [vmem:[#allocation20_spill] sm:$0xff] }
 0x1db   : > { %v978_v42 = vpop.permute.xlu0 %977  ;;  %v759_v46 = vpop.permute.xlu1 %758 }
 0x1df   : > { %v986_v0 = vpop.permute.xlu0 %985  ;;  %v832_v47 = vpop.permute.xlu1 %831 }
 0x1e0   : > { %v991_v58 = vsel %vm987_vm7, %v978_v42, %v986_v0  ;;  %v995_v13 = vsel %vm987_vm7, %v986_v0, %v978_v42 }
 0x1e1   : > { %v3036_v38 = vmul.f32 %v2720_v50, %v991_v58  ;;  %v3039_v10 = vmul.f32 %v2733_v63, %v995_v13  ;;  %v1140_v13 = vsel %vm1133_vm4, %v1130_v20, %v2945_v22 }
 0x1e3   : > { %v905_v33 = vpop.permute.xlu1 %904 }
 0x1e7   : > { %v1051_v62 = vpop.permute.xlu1 %1050 }
 0x1eb   : > { %v1124_v16 = vpop.permute.xlu1 %1123 }
 0x1ef   : > { %v619_v27 = vpop.permute.xlu1 %618 }
 0x1f0   : > { %v626_v4 = vsel %vm622_vm1, %v611_v31, %v619_v27  ;;  %v630_v45 = vsel %vm622_vm1, %v619_v27, %v611_v31  ;;  %v3349_v31 = vld [vmem:[#allocation18_spill] sm:$0xff] }
 0x1f1   : > { %v645_v60 = vmul.f32 %v2630_v18, %v630_v45  ;;  %v646_v50 = vmul.f32 %v2634_v15, %v626_v4  ;;  %v3345_v18 = vld [vmem:[#allocation32_spill] sm:$0xff]  ;;  %v3352_v45 = vld [vmem:[#allocation22_spill] sm:$0xff] }
 0x1f3   : > { %v694_v23 = vpop.permute.xlu1 %693  ;;  %v669_v28 = vmul.f32 %v3345_v18, %v645_v60  ;;  %v670_v15 = vmul.f32 %v3345_v18, %v646_v50 }
 0x1f4   : > { %v699_v63 = vsel %vm695_vm2, %v686_v55, %v694_v23  ;;  %v703_v49 = vsel %vm695_vm2, %v694_v23, %v686_v55 }
 0x1f5   : > { %v718_v8 = vmul.f32 %v2658_v35, %v703_v49  ;;  %v719_v61 = vmul.f32 %v2664_v30, %v699_v63  ;;  %v602_v35 = vmul.f32 %v3347_v51, %v3346_v37  ;;  %v603_v30 = vmul.f32 %v3347_v51, %v3348_v36  ;;  %v3355_v51 = vld [vmem:[#allocation24_spill] sm:$0xff] }
 0x1f6   : > { %v1035_v36 = vmul.f32 %v3355_v51, %v3039_v10 }
 0x1f7   : > { %v767_v7 = vpop.permute.xlu1 %766  ;;  %v742_v26 = vmul.f32 %v3349_v31, %v718_v8  ;;  %v743_v56 = vmul.f32 %v3349_v31, %v719_v61  ;;  %v677_v55 = vadd.f32 %v669_v28, %v602_v35  ;;  %v678_v42 = vadd.f32 %v670_v15, %v603_v30  ;;  %v3353_v8 = vld [vmem:[#allocation13_spill] sm:$0xff] }
 0x1f8   : > { %v772_v12 = vsel %vm768_vm3, %v759_v46, %v767_v7  ;;  %v776_v43 = vsel %vm768_vm3, %v767_v7, %v759_v46  ;;  %v3350_v46 = vld [vmem:[#allocation19_spill] sm:$0xff]  ;;  %v1081_v7 = vmul.f32 %v2738_v44, %v1063_v39  ;;  %v1034_v35 = vmul.f32 %v3355_v51, %v3036_v38  ;;  %v1443_v51 = vld [vmem:[%s3242_s7] sm:$0x1] }
 0x1f9   : > { %v791_v17 = vmul.f32 %v2669_v6, %v776_v43  ;;  %v792_v2 = vmul.f32 %v2683_v32, %v772_v12  ;;  %v751_v57 = vadd.f32 %v743_v56, %v678_v42  ;;  %v1207_v56 = vpop.permute.xlu0 %1206 }
 0x1fa   : > { %v1105_v61 = vmul.f32 %v3353_v8, %v1081_v7  ;;  %v3358_v7 = vmov 0.0  }
 0x1fb   : > { %v840_v24 = vpop.permute.xlu1 %839  ;;  %v815_v0 = vmul.f32 %v3350_v46, %v791_v17 }
 0x1fc   : > { %v845_v41 = vsel %vm841_vm5, %v832_v47, %v840_v24  ;;  %v849_v9 = vsel %vm841_vm5, %v840_v24, %v832_v47  ;;  %v816_v47 = vmul.f32 %v3350_v46, %v792_v2  ;;  %v3354_v2 = vld [vmem:[#allocation28_spill] sm:$0xff] }
 0x1fd   : > { %v864_v6 = vmul.f32 %v2689_v25, %v849_v9  ;;  %v865_v32 = vmul.f32 %v2697_v52, %v845_v41  ;;  %v1136_v52 = vsel %vm1133_vm4, %v2945_v22, %v1130_v20  ;;  %v1155_v22 = vmul.f32 %v2776_v14, %v1140_v13 }
 0x1fe   : > { %v1154_v63 = vmul.f32 %v2771_v19, %v1136_v52 }
 0x1ff   : > { %v913_v29 = vpop.permute.xlu1 %912  ;;  %v888_v27 = vmul.f32 %v3351_v3, %v864_v6  ;;  %v889_v23 = vmul.f32 %v3351_v3, %v865_v32  ;;  %v1179_v37 = vmul.f32 %v3354_v2, %v1155_v22  ;;  %v3357_v32 = vld [vmem:[#allocation15_spill] sm:$0xff] }
 0x200   : > { %v918_v54 = vsel %vm914_vm6, %v905_v33, %v913_v29  ;;  %v922_v5 = vsel %vm914_vm6, %v913_v29, %v905_v33  ;;  %v750_v33 = vadd.f32 %v742_v26, %v677_v55 }
 0x201   : > { %v937_v58 = vmul.f32 %v2705_v21, %v918_v54  ;;  %v938_v25 = vmul.f32 %v2716_v40, %v922_v5  ;;  %v1082_v21 = vmul.f32 %v2752_v48, %v1067_v34  ;;  %v824_v40 = vadd.f32 %v816_v47, %v751_v57  ;;  %v3356_v54 = vld [vmem:[#allocation27_spill] sm:$0xff] }
 0x202   : > { %v823_v4 = vadd.f32 %v815_v0, %v750_v33 }
 0x203   : > { %v1059_v1 = vpop.permute.xlu1 %1058  ;;  %v961_v24 = vmul.f32 %v3352_v45, %v937_v58  ;;  %v962_v60 = vmul.f32 %v3352_v45, %v938_v25  ;;  %v897_v43 = vadd.f32 %v889_v23, %v824_v40  ;;  %v1106_v29 = vmul.f32 %v3353_v8, %v1082_v21  ;;  %v1238_v23 = vld [vmem:[%s3240_s5] sm:$0xff]  ;;  %v1239_v21 = vld [vmem:[%s3240_s5 + $0x8] sm:$0xff]  ;;  %v1367_v40 = vld [vmem:[%s3244_s9 + $0xf8] sm:$0xff]  ;;  %v1250_v8 = vpop.permute.xlu0 %1249 }
 0x204   : > { %v1064_v20 = vsel %vm1060_vm8, %v1051_v62, %v1059_v1  ;;  %v1068_v49 = vsel %vm1060_vm8, %v1059_v1, %v1051_v62  ;;  %v896_v12 = vadd.f32 %v888_v27, %v823_v4  ;;  %v1178_v62 = vmul.f32 %v3354_v2, %v1154_v63  ;;  %v1366_v4 = vld [vmem:[%s3244_s9 + $0xf0] sm:$0xff] }
 0x205   : > { %v970_v41 = vadd.f32 %v962_v60, %v897_v43  ;;  %v1083_v9 = vmul.f32 %v2738_v44, %v1064_v20  ;;  %v1084_v17 = vmul.f32 %v2752_v48, %v1068_v49  ;;  %v1114_v44 = vadd.f32 %v1106_v29, %v3029_v11  ;;  %v1351_v60 = vld [vmem:[%s3244_s9 + $0x78] sm:$0xff] }
 0x206   : > { %v969_v15 = vadd.f32 %v961_v24, %v896_v12  ;;  %v1935_v45 = vpack.c.bf16 %v1367_v40, %v1366_v4  ;;  %v1350_v24 = vld [vmem:[%s3244_s9 + $0x70] sm:$0xff] }
 0x207   : > { %v1132_v50 = vpop.permute.xlu1 %1131  ;;  %v1107_v48 = vmul.f32 %v3356_v54, %v1083_v9  ;;  %v1108_v5 = vmul.f32 %v3356_v54, %v1084_v17  ;;  %v1043_v26 = vadd.f32 %v1035_v36, %v970_v41  ;;  %v1187_v38 = vadd.f32 %v1179_v37, %v1114_v44  ;;  %v1618_v44 = vld [vmem:[%s3245_s10] sm:$0x3] }
 0x208   : > { %v1137_v18 = vsel %vm1133_vm4, %v1124_v16, %v1132_v50  ;;  %v1141_v28 = vsel %vm1133_vm4, %v1132_v50, %v1124_v16  ;;  %v1113_v16 = vadd.f32 %v1105_v61, %v3027_v53  ;;  %v1042_v31 = vadd.f32 %v1034_v35, %v969_v15  ;;  %1936 = vmatprep.subr.bf16.mxu0 %v1935_v45  ;;  %v1518_v35 = vld [vmem:[%s3243_s8] sm:$0xff] }
 0x209   : > { %v1156_v30 = vmul.f32 %v2771_v19, %v1137_v18  ;;  %v1157_v59 = vmul.f32 %v2776_v14, %v1141_v28  ;;  %v1219_v39 = vadd.f32 %v1207_v56, %v1187_v38  ;;  %v1116_v34 = vadd.f32 %v1108_v5, %v1043_v26  ;;  %v3359_v54 = vld [vmem:[#allocation33_spill] sm:$0xff]  ;;  %v3360_v5 = vld [vmem:[#allocation34_spill] sm:$0xff] }
 0x20a   : > { %v1186_v6 = vadd.f32 %v1178_v62, %v1113_v16  ;;  %v1115_v14 = vadd.f32 %v1107_v48, %v1042_v31  ;;  %v1937_v50 = vpack.c.bf16 %v1351_v60, %v1350_v24  ;;  %v2125_v28 = vmov 0.0|0.0   ;;  %v1519_v16 = vld [vmem:[%s3243_s8 + $0x8] sm:$0xff] }
 0x20b   : > { %v1180_v1 = vmul.f32 %v3357_v32, %v1156_v30  ;;  %v1181_v10 = vmul.f32 %v3357_v32, %v1157_v59  ;;  %v1227_v46 = vmax.f32 %v1219_v39, 0.0  ;;  %v1623_v48 = vrot.slane %v1618_v44, %v3359_v54 }
 0x20c   : > { %v1218_v19 = vadd.f32 %v1207_v56, %v1186_v6  ;;  %1938 = vmatpush3.bf16.msra.mxu0 %v1937_v50  ;;  %v1627_v31 = vrot.slane %v1618_v44, %v3360_v5 }
 0x20d   : > { %v1188_v53 = vadd.f32 %v1180_v1, %v1115_v14  ;;  %v1189_v55 = vadd.f32 %v1181_v10, %v1116_v34  ;;  %v1235_v13 = vmin.f32 %v1227_v46, 6.0 }
 0x20e   : > { %v1226_v42 = vmax.f32 %v1218_v19, 0.0 }
 0x210   : > { %v1234_v52 = vmin.f32 %v1226_v42, 6.0  ;;  %v2039_v42 = vld [vmem:[%s2263_s17] sm:$0xff] }
 0x218   : > { %v1212_v11 = vpop.permute.xlu1 %1211 }
 0x219   : > { %v1220_v0 = vadd.f32 %v1212_v11, %v1188_v53  ;;  %v1221_v47 = vadd.f32 %v1212_v11, %v1189_v55 }
 0x21b   : > { %v1228_v58 = vmax.f32 %v1220_v0, 0.0  ;;  %v1229_v25 = vmax.f32 %v1221_v47, 0.0  ;;  %v2040_v0 = vld [vmem:[%s2263_s17 + $0x8] sm:$0xff] }
 0x21c   : > { %v1245_v22 = vpop.permute.xlu1 %1244 }
 0x21d   : > { %v1236_v33 = vmin.f32 %v1228_v58, 6.0  ;;  %v1237_v57 = vmin.f32 %v1229_v25, 6.0 }
 0x21f   : > { %v1903_v3 = vpack.c.bf16 %v1237_v57, %v1235_v13  ;;  %v1905_v27 = vpack.c.bf16 %v1236_v33, %v1234_v52  ;;  %v2041_v33 = vld [vmem:[%s2263_s17 + $0x10] sm:$0xff] }
 0x221   : > { %1904 = vmatprep.subr.bf16.mxu1 %v1903_v3  ;;  %v2042_v3 = vld [vmem:[%s2263_s17 + $0x18] sm:$0xff] }
 0x222   : > { %1906 = vmatpush1.bf16.msra.mxu1 %v1905_v27 }
 0x223   : > { %1939 = vmatprep.subr.bf16.mxu1 %v2125_v28 }
 0x225   : > { %1818 = vmatmul.mubr.msk.f32.vlgmr.msra.gmra.mrb[0].mxu1 %vm1252_vm9, %v1238_v23 }
 0x226   : > { %1329 = vmatprep.mubr.f32.mxu1 %v3358_v7 }
 0x229   : > { %1819 = vmatmul.mubr.msk.f32.gmra.mrb[2].mxu1 %vm1252_vm9, %v1239_v21 }
 0x22a   : > { %1887 = vmatprep.mubr.msk.f32.mxu1 %vm2126_vm10, %v3358_v7 }
 0x2f8   : > { %v1325_v63 = vpop.f32.mrb[0].mxu1 }
 0x2f9   : > { %v1327_v20 = vpop.f32.mrb[1].mxu1  ;;  %v1326_v12 = vadd.f32 %v1325_v63, %v1245_v22 }
 0x2fa   : > { %v3146_v49 = vadd.f32 %v1327_v20, %v1245_v22 }
 0x2fc   : > { %v1331_v43 = vpop.f32.mrb[2].mxu1  ;;  %1432 = vmatprep.mubr.f32.mxu0 %v3146_v49 }
 0x2fd   : > { %v1333_v61 = vpop.f32.mrb[3].mxu1  ;;  %1433 = vmatmul.mubr.f32.vlgmr.msra.gmra.mrb[8].mxu0 %v1326_v12  ;;  %v3151_v18 = vadd.f32 %v1331_v43, %v1250_v8 }
 0x2fe   : > { %v3149_v29 = vadd.f32 %v1333_v61, %v1250_v8 }
 0x300   : > { %1437 = vmatprep.mubr.f32.mxu0 %v3149_v29 }
 0x301   : > { %1438 = vmatmul.mubr.f32.gmra.mrb[10].mxu0 %v3151_v18 }
 0x3d0   : > { %v1871_v15 = vpop.f32.mrb[8].mxu0 }
 0x3d1   : > { %v1872_v41 = vpop.f32.mrb[9].mxu0 }
 0x3d2   : > { %v1873_v9 = vadd.f32 %v1872_v41, %v1871_v15 }
 0x3d4   : > { %v1874_v17 = vpop.f32.mrb[10].mxu0 }
 0x3d5   : > { %v1875_v2 = vpop.f32.mrb[11].mxu0 }
 0x3d6   : > { %v1876_v62 = vadd.f32 %v1875_v2, %v1874_v17 }
 0x3d8   : > { %v1940_v37 = vpack.c.bf16 %v1876_v62, %v1873_v9 }
 0x3da   : > { %1941 = vmatpush3.bf16.msra.mxu1 %v1940_v37 }
 0x3dd   : > { %1888 = vmatmul.mubr.msk.f32.vlgmr.msra.gmra.mrb[4].mxu1 %vm454_vm0, %v1443_v51 }
 0x3de   : > { %1892 = vmatprep.mubr.msk.f32.mxu1 %vm1520_vm11, %v1518_v35 }
 0x4b0   : > { %v1513_v36 = vpop.f32.mrb[4].mxu1 }
 0x4b1   : > { %v1517_v30 = vmax.f32 %v1513_v36, 0.0  ;;  %v1889_v59 = vpop.f32.mrb[5].mxu1 }
 0x4b3   : > { %1890 = vmatprep.subr.msk.mxu1 %vm1527_vm12, %v1517_v30 }
 0x4b4   : > { %1891 = vmatpush3.msk.msra.mxu1 %vm1527_vm12, %v1517_v30 }
 0x4b5   : > { %1893 = vmatmul.mubr.msk.f32.vlgmr.msra.gmra.mrb[6].mxu1 %vm1520_vm11, %v1519_v16  ;;  %1826 = vmatprep.subr.msk.mxu1 %vm1527_vm12, %v1627_v31 }
 0x4b6   : > { %1702 = vmatprep.mubr.f32.mxu1 %v3358_v7  ;;  %1827 = vmatpush1.msk.msra.mxu1 %vm1527_vm12, %v1623_v48 }
 0x588   : > { %v1894_v26 = vpop.f32.mrb[6].mxu1 }
 0x589   : > { %v1825_v56 = vmul.f32 -1.442695, %v1894_v26  ;;  %v1597_v6 = vpop.f32.mrb[7].mxu1 }
 0x58a   : > { %v1824_v38 = vmul.f32 -1.442695, %v1597_v6 }
 0x58b   : > { %2031 = vpow2.f32 %v1825_v56 }
 0x58c   : > { %2033 = vpow2.f32 %v1824_v38 }
 0x595   : > { %v2032_v32 = vpop.eup %2031 }
 0x596   : > { %v2034_v1 = vpop.eup %2033  ;;  %v1613_v19 = vadd.f32 1.0, %v2032_v32 }
 0x597   : > { %v1612_v10 = vadd.f32 1.0, %v2034_v1 }
 0x599   : > { %2035 = vrcp.f32 %v1612_v10 }
 0x59a   : > { %2037 = vrcp.f32 %v1613_v19 }
 0x5a3   : > { %v2036_v39 = vpop.eup %2035 }
 0x5a4   : > { %1828 = vmatmul.mubr.msk.f32.vlgmr.msra.gmra.mrb[8].mxu1 %vm1520_vm11, %v2036_v39  ;;  %v2038_v14 = vpop.eup %2037 }
 0x5a5   : > { %1708 = vmatprep.mubr.f32.mxu1 %v3358_v7 }
 0x5a8   : > { %1829 = vmatmul.mubr.msk.f32.gmra.mrb[10].mxu1 %vm1520_vm11, %v2038_v14 }
 0x677   : > { %v1704_v34 = vpop.f32.mrb[8].mxu1 }
 0x678   : > { %v1715_v53 = vmul.f32 %v1704_v34, %v1326_v12  ;;  %v1706_v55 = vpop.f32.mrb[9].mxu1 }
 0x679   : > { %v1716_v11 = vmul.f32 %v1706_v55, %v3146_v49 }
 0x67a   : > { %v1719_v46 = vadd.f32 %v2039_v42, %v1715_v53 }
 0x67b   : > { %v1720_v47 = vadd.f32 %v2040_v0, %v1716_v11  ;;  %v1710_v58 = vpop.f32.mrb[10].mxu1 }
 0x67c   : > { %1723 = vst [vmem:[%s409_s1] sm:$0xff] %v1719_v46  ;;  %v1717_v25 = vmul.f32 %v1710_v58, %v3151_v18  ;;  %v1712_v52 = vpop.f32.mrb[11].mxu1 }
 0x67d   : > { %1724 = vst [vmem:[%s409_s1 + $0x8] sm:$0xff] %v1720_v47  ;;  %v1718_v13 = vmul.f32 %v1712_v52, %v3149_v29 }
 0x67e   : > { %v1721_v57 = vadd.f32 %v2041_v33, %v1717_v25 }
 0x67f   : > { %v1722_v27 = vadd.f32 %v2042_v3, %v1718_v13 }
 0x680   : > { %1725 = vst [vmem:[%s409_s1 + $0x10] sm:$0xff] %v1721_v57 }
 0x681   : > { %1726 = vst [vmem:[%s409_s1 + $0x18] sm:$0xff] %v1722_v27 }
 0x682   : > { %2056 = shalt.err (!%p2053_p3)
}
 0x683   : > { %s2057_s17 = scalar_lea.hbm %s3191_s0, 512  ;;  %s2061_s15 = scalar_lea.hbm %s3247_s12, 1024 }
 0x684   : > { %p2058_p4 = scmp.ne.s32.totalorder %s3191_s0, %s2057_s17  ;;  %p2062_p9 = scmp.lt.u32.totalorder %s3191_s0, %s3247_s12 }
 0x685   : > { %p2063_p10 = scmp.lt.u32.totalorder %s2061_s15, %s2057_s17  ;;  %p2065_p12 = scmp.lt.u32.totalorder %s2057_s17, %s3191_s0 }
 0x686   : > { %p2059_p7 = pnand %p2058_p4, %p2232_p5 }
 0x687   : > { %p2064_p11 = por %p2063_p10, %p2062_p9 }
 0x688   : > { %p2060_p8 = pneg %p2059_p7 }
 0x689   : > { %p2066_p13 = por %p2065_p12, %p2064_p11 }
 0x68b   : > { %p2067_p0 = pnand %p2066_p13, %p2060_p8 }
 0x68d   : > { %2070 = shalt.err (!%p2067_p0)
}
 0x68e   : > { %s2128_s3 = smov 256  }
 0x68f   : > { %1942 = dma.vmem_to_hbm [thread:$0]  (%p2232_p5), %s3184_s2, 512, %s3191_s0, %s3193_s25, %s2128_s3, %s2128_s3, %s3326_s18  }
 0x690 PF: > { %p1948_p1 = scmp.ge.s32.totalorder %s2105_s24, 2  ;;  %s1757_s16 = sand.u32 1, %s2093_s21  }
 0x691   : > { %s1758_s28 = scalar_lea.sflag [#allocation3], %s1757_s16 }
 0x692   : > { %p1945_p2 = pnand %p1948_p1, %p2236_p6 }
 0x694   : > { %2088 = dma.done.wait (!%p1945_p2), %s1758_s28, 512  }
 0x695   : > { %2090 = vsyncadd (!%p1945_p2), %s1758_s28, 4294966784  ;;  %p22_p3 = scmp.ge.s32.totalorder %s2219_s27, 4   ;;  %s3361_s21 = smov %s2097_s22 }
 0x696   : > { %s3362_s22 = smov %s2101_s23  ;;  %s3363_s23 = smov %s2230_s30 }
 0x697   : > { %s3364_s24 = smov %s2219_s27  ;;  %24 = sbr.rel (!%p22_p3) target bundleno = 8 (0x8), region = 103 }
 0x69e   :  { %1763 = vsyncpa [#allocation3], 1 }
 0x69f   :  { %1765 = vsyncpa [#allocation3 + $0x1], 1 }

</bundles_post_ra>
